<compile_context>
chip_gen: v6e
topology: v6e:2x2x1
jax: 0.10.0
libtpu: 0.0.40
codegen_flags: <defaults>
</compile_context>

<pallas_src>
import numpy as np
import jax
import jax.numpy as jnp
from jax import lax
from jax.experimental import pallas as pl
from jax.experimental.pallas import tpu as pltpu

EPS = 1e-5
VMEM_LIMIT = 32 * 1024 * 1024   # far above actual use (<1 MiB); safe on v5e/v6e/v7x


def _compiler_params():
    return pltpu.CompilerParams(
        dimension_semantics=("parallel",),    # batch axis -> both TCs on v7x
        vmem_limit_bytes=VMEM_LIMIT,
    )


# ----------------------------- Pallas kernels -----------------------------

def _upconv_kernel(x_ref, w_ref, b_ref, o_ref, st_ref):
    # ConvTranspose2d(k=2,s=2) + bias + ReLU as ONE matmul:
    #   (H, W*Cin) @ (W*Cin, 2*Wup*Cp); columns [0:Wup*Cp] are output row 2i,
    #   columns [Wup*Cp:] are output row 2i+1.  Indicator lanes come from the
    #   bias (their weight columns are zero), so no masking is needed.
    y = jnp.dot(x_ref[0], w_ref[...], preferred_element_type=jnp.float32)
    y = jnp.maximum(y + b_ref[...], 0.0)
    o_ref[0] = y.astype(o_ref.dtype)
    # BatchNorm partials (post-ReLU, f32); per-channel reduction is XLA glue.
    st_ref[0, 0:1, :] = jnp.sum(y, axis=0, keepdims=True)
    st_ref[0, 1:2, :] = jnp.sum(y * y, axis=0, keepdims=True)


def _make_conv_kernel(n_src, hs, out_cols, src_rows):
    """3x3 conv (pad=1) over `n_src` W-folded sources: 3 banded matmuls each.

    ref order: [src0, band0, src1, band1, ..., bias, out, stats, pad0, pad1, ...]
    The previous stage's BatchNorm is already folded into the bands (scale on real
    lanes, shift on the indicator lane), so the sources are raw post-ReLU values.
    """
    def kernel(*refs):
        bias_ref = refs[2 * n_src]
        o_ref = refs[2 * n_src + 1]
        st_ref = refs[2 * n_src + 2]
        pads = refs[2 * n_src + 3:]
        acc = jnp.zeros((hs, out_cols), jnp.float32) + bias_ref[...]
        for s in range(n_src):
            src_ref, band_ref, pad = refs[2 * s], refs[2 * s + 1], pads[s]
            # row-halo scratch: one zero row above/below (kh padding); the band
            # already handles all W-direction padding.
            pad[...] = jnp.zeros_like(pad)
            pad[1:1 + src_rows[s], :] = src_ref[0].astype(jnp.float32)
            for kh in range(3):                       # 3 matmuls; kw lives in the band
                acc = acc + jnp.dot(pad[kh:kh + hs, :].astype(jnp.bfloat16),
                                    band_ref[kh],
                                    preferred_element_type=jnp.float32)
        y = jnp.maximum(acc, 0.0)                     # ReLU (stats are post-ReLU)
        o_ref[0] = y.astype(o_ref.dtype)
        st_ref[0, 0:1, :] = jnp.sum(y, axis=0, keepdims=True)
        st_ref[0, 1:2, :] = jnp.sum(y * y, axis=0, keepdims=True)
    return kernel


# ---------------------------- pallas_call wrappers ---------------------------

def _upconv_call(x, band, bias, out_cols):
    n, h, _ = x.shape
    return pl.pallas_call(
        _upconv_kernel,
        grid=(n,),
        in_specs=[
            pl.BlockSpec((1,) + x.shape[1:], lambda i: (i, 0, 0)),
            pl.BlockSpec(band.shape, lambda i: (0, 0)),
            pl.BlockSpec(bias.shape, lambda i: (0, 0)),
        ],
        out_specs=(
            pl.BlockSpec((1, h, out_cols), lambda i: (i, 0, 0)),
            pl.BlockSpec((1, 2, out_cols), lambda i: (i, 0, 0)),
        ),
        out_shape=(
            jax.ShapeDtypeStruct((n, h, out_cols), jnp.bfloat16),
            jax.ShapeDtypeStruct((n, 2, out_cols), jnp.float32),
        ),
        compiler_params=_compiler_params(),
    )(x, band, bias)


def _conv_call(srcs, bands, bias, hs, out_cols, src_rows):
    n = srcs[0].shape[0]
    in_specs, args = [], []
    for src, band in zip(srcs, bands):
        in_specs.append(pl.BlockSpec((1,) + src.shape[1:], lambda i: (i, 0, 0)))
        in_specs.append(pl.BlockSpec(band.shape, lambda i: (0, 0, 0)))
        args += [src, band]
    in_specs.append(pl.BlockSpec(bias.shape, lambda i: (0, 0)))
    args.append(bias)
    scratch = [pltpu.VMEM((hs + 2, src.shape[-1]), jnp.float32) for src in srcs]
    return pl.pallas_call(
        _make_conv_kernel(len(srcs), hs, out_cols, tuple(src_rows)),
        grid=(n,),
        in_specs=in_specs,
        out_specs=(
            pl.BlockSpec((1, hs, out_cols), lambda i: (i, 0, 0)),
            pl.BlockSpec((1, 2, out_cols), lambda i: (i, 0, 0)),
        ),
        out_shape=(
            jax.ShapeDtypeStruct((n, hs, out_cols), jnp.bfloat16),
            jax.ShapeDtypeStruct((n, 2, out_cols), jnp.float32),
        ),
        scratch_shapes=scratch,
        compiler_params=_compiler_params(),
    )(*args)


# ------------------------------ XLA glue helpers -----------------------------

def _pick_cp(min_cp, w_pix):
    # smallest per-pixel lane count >= min_cp that makes w_pix*cp a multiple of 128
    # (lane-dense stores); fall back to min_cp (full-extent blocks stay legal).
    for cand in range(min_cp, 2 * min_cp + 9):
        if (w_pix * cand) % 128 == 0:
            return cand
    return min_cp


def _pixel_bias(b, cp, ind, n_pix):
    # per-pixel bias vector; the indicator lane is biased to 1.0 (its weight
    # columns are zero and ReLU keeps it at 1.0), so the kernel needs no masking.
    per = jnp.zeros((cp,), jnp.float32).at[:b.shape[0]].set(b).at[ind].set(1.0)
    return jnp.tile(per, n_pix).reshape(1, n_pix * cp)


def _upconv_band(wt, w, cp, dtype):
    # wt: (Cin, Cout, 2, 2) ConvTranspose2d weight -> (W*Cin, 2 * 2W * Cp)
    # column index = dh*(2W*Cp) + (2j+dw)*Cp + o.
    ci, co = wt.shape[0], wt.shape[1]
    b6 = jnp.einsum('jk,codw->jcdkwo', jnp.eye(w, dtype=jnp.float32),
                    wt.astype(jnp.float32))               # (W, Cin, 2, W, 2, Cout)
    b6 = jnp.pad(b6, ((0, 0),) * 5 + ((0, cp - co),))
    return b6.reshape(w * ci, 2 * (2 * w) * cp).astype(dtype)


def _conv_band(w_oihw, ch_off, cin, cp_in, w_in, w_out, cp_out, dtype,
               scale=None, shift=None, ind=None):
    # w_oihw: (Cout, Ctot, 3, 3) Conv2d weight.  Returns (3, w_in*cp_in, w_out*cp_out)
    # banded weights: kw taps and all W-direction zero padding live in the band; an
    # optional input BatchNorm (scale, shift) is folded in, the shift riding on the
    # source's constant indicator lane `ind` (zero at spatial padding -> exact).
    co = w_oihw.shape[0]
    wk = jnp.transpose(w_oihw[:, ch_off:ch_off + cin], (2, 3, 1, 0)).astype(jnp.float32)
    sel = np.zeros((3, w_in, w_out), np.float32)          # sel[kw, wi, wo]
    for kw in range(3):
        for wo in range(w_out):
            wi = wo + kw - 1
            if 0 <= wi < w_in:
                sel[kw, wi, wo] = 1.0
    sel = jnp.asarray(sel)
    wk_s = wk if scale is None else wk * scale[None, None, :, None]
    band = jnp.zeros((3, w_in, cp_in, w_out, cp_out), jnp.float32)
    band = band.at[:, :, :cin, :, :co].set(jnp.einsum('kab,xkco->xacbo', sel, wk_s))
    if shift is not None:
        wsh = jnp.einsum('xkco,c->xko', wk, shift)
        band = band.at[:, :, ind, :, :co].set(jnp.einsum('kab,xko->xabo', sel, wsh))
    return band.reshape(3, w_in * cp_in, w_out * cp_out).astype(dtype)


def _bn_fold(stats, count, cp, co, gamma, beta):
    # per-image (sum, sum_sq) partials -> per-channel scale/shift (tiny XLA glue).
    # NOTE: E[x^2]-E[x]^2 in f32 is fine at these sizes; Welford for production N*H*W.
    s = stats.reshape(stats.shape[0], 2, -1, cp).sum(axis=(0, 2))     # (2, cp)
    mean = s[0, :co] / count
    var = jnp.maximum(s[1, :co] / count - mean * mean, 0.0)
    scale = gamma * lax.rsqrt(var + EPS)
    shift = beta - mean * scale
    return scale, shift


# --------------------------------- forward ----------------------------------

@jax.jit
def unet_block_up(x_nchw, saved_nchw, params):
    n, ci, h, w = x_nchw.shape
    _, cs, hs, ws = saved_nchw.shape
    co = params["w_up"].shape[1]
    hu, wu = 2 * h, 2 * w
    assert hs in (hu, hu + 1) and ws in (wu, wu + 1)
    assert params["w1"].shape[1] == co + cs
    ind = co                                   # per-pixel indicator lane index
    cp = _pick_cp(co + 1, ws)                  # per-pixel padded lanes of stage outputs
    assert ind < cp
    bf = jnp.bfloat16

    # layout glue: NCHW -> W-folded (N, H, W*C) bf16 (no zero channel lanes)
    x = jnp.transpose(x_nchw, (0, 2, 3, 1)).reshape(n, h, w * ci).astype(bf)
    saved = jnp.transpose(saved_nchw, (0, 2, 3, 1)).reshape(n, hs, ws * cs).astype(bf)

    # ---- stage 1: ConvTranspose2d(k=2,s=2) + ReLU (1 matmul) + BN partials ----
    band_u = _upconv_band(params["w_up"], w, cp, bf)
    bias_u = _pixel_bias(params["b_up"], cp, ind, 2 * wu)
    u2, st_u = _upconv_call(x, band_u, bias_u, 2 * wu * cp)
    u = u2.reshape(n, hu, wu * cp)             # free reshape: 2i / 2i+1 row interleave
    sc_u, sh_u = _bn_fold(st_u, n * hu * wu, cp, co, params["g_up"], params["bt_up"])

    # ---- stage 2: conv1 over [BN(up) ++ saved]; concat never materialized ----
    b1u = _conv_band(params["w1"], 0, co, cp, wu, ws, cp, bf,
                     scale=sc_u, shift=sh_u, ind=ind)
    b1s = _conv_band(params["w1"], co, cs, cs, ws, ws, cp, bf)
    bias1 = _pixel_bias(params["b1"], cp, ind, ws)
    h1, st1 = _conv_call([u, saved], [b1u, b1s], bias1, hs, ws * cp, (hu, hs))
    sc1, sh1 = _bn_fold(st1, n * hs * ws, cp, co, params["g1"], params["bt1"])

    # ---- stage 3: conv2 over BN(h1) (BN folded into the band) ----
    b2 = _conv_band(params["w2"], 0, co, cp, ws, ws, cp, bf,
                    scale=sc1, shift=sh1, ind=ind)
    bias2 = _pixel_bias(params["b2"], cp, ind, ws)
    h2, st2 = _conv_call([h1], [b2], bias2, hs, ws * cp, (hs,))
    sc2, sh2 = _bn_fold(st2, n * hs * ws, cp, co, params["g2"], params["bt2"])

    # ---- stage 4 (XLA epilogue): final BN affine + channel slice + NHWC->NCHW ----
    y = h2.reshape(n, hs, ws, cp)[..., :co].astype(jnp.float32)
    y = y * sc2.reshape(1, 1, 1, co) + sh2.reshape(1, 1, 1, co)
    return jnp.transpose(y, (0, 3, 1, 2))


# --------------------------- pure-JAX reference -----------------------------

def _bn_ref(y, g, b):
    mean = jnp.mean(y, axis=(0, 2, 3), keepdims=True)
    var = jnp.mean((y - mean) ** 2, axis=(0, 2, 3), keepdims=True)
    return (y - mean) * lax.rsqrt(var + EPS) * g.reshape(1, -1, 1, 1) \
        + b.reshape(1, -1, 1, 1)


def _conv_relu_bn_ref(z, wgt, b, g, bt):
    y = lax.conv_general_dilated(z, wgt, (1, 1), ((1, 1), (1, 1)),
                                 dimension_numbers=("NCHW", "OIHW", "NCHW"))
    y = jnp.maximum(y + b.reshape(1, -1, 1, 1), 0.0)
    return _bn_ref(y, g, bt)


def _reference(x, saved, p):
    n, ci, hh, ww = x.shape
    co = p["w_up"].shape[1]
    t = jnp.einsum('ncij,coab->noiajb', x, p["w_up"])
    y = t.reshape(n, co, 2 * hh, 2 * ww) + p["b_up"].reshape(1, -1, 1, 1)
    y = jnp.maximum(y, 0.0)
    y = _bn_ref(y, p["g_up"], p["bt_up"])
    if y.shape[2] < saved.shape[2]:
        y = jnp.concatenate([y, jnp.zeros_like(y[:, :, :1, :])], axis=2)
    if y.shape[3] < saved.shape[3]:
        y = jnp.concatenate([y, jnp.zeros_like(y[:, :, :, :1])], axis=3)
    z = jnp.concatenate([y, saved], axis=1)
    z = _conv_relu_bn_ref(z, p["w1"], p["b1"], p["g1"], p["bt1"])
    z = _conv_relu_bn_ref(z, p["w2"], p["b2"], p["g2"], p["bt2"])
    return z


# --------------------------------- main -------------------------------------

if __name__ == "__main__":
    in_dim, out_dim = 8, 4
    N, H, W = 2, 8, 8                      # x: (2, 8, 8, 8) -> output (2, 4, 16, 16)

    ks = jax.random.split(jax.random.PRNGKey(0), 14)
    params = {
        "w_up": 0.2 * jax.random.normal(ks[0], (in_dim, out_dim, 2, 2), jnp.float32),
        "b_up": 0.1 * jax.random.normal(ks[1], (out_dim,), jnp.float32),
        "g_up": 1.0 + 0.1 * jax.random.normal(ks[2], (out_dim,), jnp.float32),
        "bt_up": 0.1 * jax.random.normal(ks[3], (out_dim,), jnp.float32),
        "w1": 0.2 * jax.random.normal(ks[4], (out_dim, in_dim, 3, 3), jnp.float32),
        "b1": 0.1 * jax.random.normal(ks[5], (out_dim,), jnp.float32),
        "g1": 1.0 + 0.1 * jax.random.normal(ks[6], (out_dim,), jnp.float32),
        "bt1": 0.1 * jax.random.normal(ks[7], (out_dim,), jnp.float32),
        "w2": 0.2 * jax.random.normal(ks[8], (out_dim, out_dim, 3, 3), jnp.float32),
        "b2": 0.1 * jax.random.normal(ks[9], (out_dim,), jnp.float32),
        "g2": 1.0 + 0.1 * jax.random.normal(ks[10], (out_dim,), jnp.float32),
        "bt2": 0.1 * jax.random.normal(ks[11], (out_dim,), jnp.float32),
    }
    x = jax.random.normal(ks[12], (N, in_dim, H, W), jnp.float32)
    saved_x = jax.random.normal(ks[13], (N, in_dim - out_dim, 2 * H, 2 * W), jnp.float32)

    out = jax.block_until_ready(unet_block_up(x, saved_x, params))
    ref = _reference(x, saved_x, params)

    assert out.shape == (N, out_dim, 2 * H, 2 * W), out.shape
    err = float(jnp.max(jnp.abs(out - ref)))
    # bf16 matmul operands + bf16 inter-stage activations (f32 accumulation):
    # mixed-precision tolerance vs the f32 reference.
    assert err < 1e-1, err
    print("KERNEL_OK")
</pallas_src>

<mosaic_0001>
module attributes {stable_mosaic.version = 11 : i64} {
  func.func @_upconv_kernel(%arg0: i32, %arg1: memref<1x8x64xbf16, #tpu.memory_space<vmem>>, %arg2: memref<64x256xbf16, #tpu.memory_space<vmem>>, %arg3: memref<1x256xf32, #tpu.memory_space<vmem>>, %arg4: memref<1x8x256xbf16, #tpu.memory_space<vmem>>, %arg5: memref<1x2x256xf32, #tpu.memory_space<vmem>>) attributes {dimension_semantics = [#tpu.dimension_semantics<parallel>], iteration_bounds = array<i64: 2>, scalar_prefetch = 0 : i64, scratch_operands = 0 : i64, tpu.core_type = #tpu.core_type<tc>, window_params = [{transform_indices = @transform_0, window_bounds = array<i64: 1, 8, 64>}, {pipeline_mode = #tpu.pipeline_mode<synchronous>, transform_indices = @transform_1, window_bounds = array<i64: 64, 256>}, {pipeline_mode = #tpu.pipeline_mode<synchronous>, transform_indices = @transform_2, window_bounds = array<i64: 1, 256>}, {transform_indices = @transform_3, window_bounds = array<i64: 1, 8, 256>}, {transform_indices = @transform_4, window_bounds = array<i64: 1, 2, 256>}]} {
    %c0 = arith.constant 0 : index
    %c0_0 = arith.constant 0 : index
    %c0_1 = arith.constant 0 : index
    %0 = vector.load %arg1[%c0, %c0_0, %c0_1] : memref<1x8x64xbf16, #tpu.memory_space<vmem>>, vector<1x8x64xbf16>
    %1 = vector.shape_cast %0 : vector<1x8x64xbf16> to vector<8x64xbf16>
    %c0_2 = arith.constant 0 : index
    %c0_3 = arith.constant 0 : index
    %2 = vector.load %arg2[%c0_2, %c0_3] : memref<64x256xbf16, #tpu.memory_space<vmem>>, vector<64x256xbf16>
    %cst = arith.constant dense<0.000000e+00> : vector<8x256xf32>
    %3 = tpu.matmul %1, %2, %cst {dimension_numbers = #tpu.dot_dimension_numbers<[1], [0], [0], [1], [0, 0, 1, 1], [], []>} : vector<8x64xbf16>, vector<64x256xbf16>, vector<8x256xf32> -> vector<8x256xf32>
    %c0_4 = arith.constant 0 : index
    %c0_5 = arith.constant 0 : index
    %4 = vector.load %arg3[%c0_4, %c0_5] : memref<1x256xf32, #tpu.memory_space<vmem>>, vector<1x256xf32>
    %5 = vector.broadcast %4 : vector<1x256xf32> to vector<8x256xf32>
    %6 = arith.addf %3, %5 : vector<8x256xf32>
    %cst_6 = arith.constant 0.000000e+00 : f32
    %7 = vector.broadcast %cst_6 : f32 to vector<8x256xf32>
    %8 = arith.maximumf %6, %7 : vector<8x256xf32>
    %9 = arith.truncf %8 : vector<8x256xf32> to vector<8x256xbf16>
    %c0_7 = arith.constant 0 : index
    %c0_8 = arith.constant 0 : index
    %c0_9 = arith.constant 0 : index
    %10 = vector.load %arg4[%c0_7, %c0_8, %c0_9] : memref<1x8x256xbf16, #tpu.memory_space<vmem>>, vector<1x8x256xbf16>
    %11 = vector.shape_cast %10 : vector<1x8x256xbf16> to vector<8x256xbf16>
    %12 = vector.shape_cast %9 : vector<8x256xbf16> to vector<1x8x256xbf16>
    tpu.vector_store %arg4[%c0_7, %c0_8, %c0_9], %12 {strides = array<i32>} : memref<1x8x256xbf16, #tpu.memory_space<vmem>>, vector<1x8x256xbf16>,
    %cst_10 = arith.constant dense<0.000000e+00> : vector<256xf32>
    %13 = vector.multi_reduction <add>, %8, %cst_10 [0] : vector<8x256xf32> to vector<256xf32>
    %14 = vector.shape_cast %13 : vector<256xf32> to vector<1x256xf32>
    %c0_11 = arith.constant 0 : index
    %c0_12 = arith.constant 0 : index
    %c0_13 = arith.constant 0 : index
    %15 = vector.load %arg5[%c0_11, %c0_12, %c0_13] : memref<1x2x256xf32, #tpu.memory_space<vmem>>, vector<1x1x256xf32>
    %16 = vector.shape_cast %15 : vector<1x1x256xf32> to vector<1x256xf32>
    %17 = vector.shape_cast %14 : vector<1x256xf32> to vector<1x1x256xf32>
    tpu.vector_store %arg5[%c0_11, %c0_12, %c0_13], %17 {strides = array<i32>} : memref<1x2x256xf32, #tpu.memory_space<vmem>>, vector<1x1x256xf32>,
    %18 = arith.mulf %8, %8 : vector<8x256xf32>
    %cst_14 = arith.constant dense<0.000000e+00> : vector<256xf32>
    %19 = vector.multi_reduction <add>, %18, %cst_14 [0] : vector<8x256xf32> to vector<256xf32>
    %20 = vector.shape_cast %19 : vector<256xf32> to vector<1x256xf32>
    %c0_15 = arith.constant 0 : index
    %c1 = arith.constant 1 : index
    %c0_16 = arith.constant 0 : index
    %21 = vector.load %arg5[%c0_15, %c1, %c0_16] : memref<1x2x256xf32, #tpu.memory_space<vmem>>, vector<1x1x256xf32>
    %22 = vector.shape_cast %21 : vector<1x1x256xf32> to vector<1x256xf32>
    %23 = vector.shape_cast %20 : vector<1x256xf32> to vector<1x1x256xf32>
    tpu.vector_store %arg5[%c0_15, %c1, %c0_16], %23 {strides = array<i32>} : memref<1x2x256xf32, #tpu.memory_space<vmem>>, vector<1x1x256xf32>,
    return
  }
  func.func @transform_0(%arg0: i32) -> (i32, i32, i32) {
    %c0_i32 = arith.constant 0 : i32
    %c0_i32_0 = arith.constant 0 : i32
    %c0_i32_1 = arith.constant 0 : i32
    return %arg0, %c0_i32, %c0_i32_0 : i32, i32, i32
  }
  func.func @transform_1(%arg0: i32) -> (i32, i32) {
    %c0_i32 = arith.constant 0 : i32
    %c0_i32_0 = arith.constant 0 : i32
    %c0_i32_1 = arith.constant 0 : i32
    return %c0_i32, %c0_i32_0 : i32, i32
  }
  func.func @transform_2(%arg0: i32) -> (i32, i32) {
    %c0_i32 = arith.constant 0 : i32
    %c0_i32_0 = arith.constant 0 : i32
    %c0_i32_1 = arith.constant 0 : i32
    return %c0_i32, %c0_i32_0 : i32, i32
  }
  func.func @transform_3(%arg0: i32) -> (i32, i32, i32) {
    %c0_i32 = arith.constant 0 : i32
    %c0_i32_0 = arith.constant 0 : i32
    %c0_i32_1 = arith.constant 0 : i32
    return %arg0, %c0_i32, %c0_i32_0 : i32, i32, i32
  }
  func.func @transform_4(%arg0: i32) -> (i32, i32, i32) {
    %c0_i32 = arith.constant 0 : i32
    %c0_i32_0 = arith.constant 0 : i32
    %c0_i32_1 = arith.constant 0 : i32
    return %arg0, %c0_i32, %c0_i32_0 : i32, i32, i32
  }
}

module attributes {stable_mosaic.version = 11 : i64} {
  func.func @kernel(%arg0: i32, %arg1: memref<1x16x128xbf16, #tpu.memory_space<vmem>>, %arg2: memref<3x128x128xbf16, #tpu.memory_space<vmem>>, %arg3: memref<1x16x64xbf16, #tpu.memory_space<vmem>>, %arg4: memref<3x64x128xbf16, #tpu.memory_space<vmem>>, %arg5: memref<1x128xf32, #tpu.memory_space<vmem>>, %arg6: memref<1x16x128xbf16, #tpu.memory_space<vmem>>, %arg7: memref<1x2x128xf32, #tpu.memory_space<vmem>>, %arg8: memref<18x128xf32, #tpu.memory_space<vmem>>, %arg9: memref<18x64xf32, #tpu.memory_space<vmem>>) attributes {dimension_semantics = [#tpu.dimension_semantics<parallel>], iteration_bounds = array<i64: 2>, scalar_prefetch = 0 : i64, scratch_operands = 2 : i64, tpu.core_type = #tpu.core_type<tc>, window_params = [{transform_indices = @transform_0, window_bounds = array<i64: 1, 16, 128>}, {pipeline_mode = #tpu.pipeline_mode<synchronous>, transform_indices = @transform_1, window_bounds = array<i64: 3, 128, 128>}, {transform_indices = @transform_2, window_bounds = array<i64: 1, 16, 64>}, {pipeline_mode = #tpu.pipeline_mode<synchronous>, transform_indices = @transform_3, window_bounds = array<i64: 3, 64, 128>}, {pipeline_mode = #tpu.pipeline_mode<synchronous>, transform_indices = @transform_4, window_bounds = array<i64: 1, 128>}, {transform_indices = @transform_5, window_bounds = array<i64: 1, 16, 128>}, {transform_indices = @transform_6, window_bounds = array<i64: 1, 2, 128>}]} {
    %cst = arith.constant 0.000000e+00 : f32
    %0 = vector.broadcast %cst : f32 to vector<16x128xf32>
    %c0 = arith.constant 0 : index
    %c0_0 = arith.constant 0 : index
    %1 = vector.load %arg5[%c0, %c0_0] : memref<1x128xf32, #tpu.memory_space<vmem>>, vector<1x128xf32>
    %2 = vector.broadcast %1 : vector<1x128xf32> to vector<16x128xf32>
    %3 = arith.addf %0, %2 : vector<16x128xf32>
    %cst_1 = arith.constant 0.000000e+00 : f32
    %4 = vector.broadcast %cst_1 : f32 to vector<18x128xf32>
    %c0_2 = arith.constant 0 : index
    %c0_3 = arith.constant 0 : index
    %5 = vector.load %arg8[%c0_2, %c0_3] : memref<18x128xf32, #tpu.memory_space<vmem>>, vector<18x128xf32>
    tpu.vector_store %arg8[%c0_2, %c0_3], %4 {strides = array<i32>} : memref<18x128xf32, #tpu.memory_space<vmem>>, vector<18x128xf32>,
    %c0_4 = arith.constant 0 : index
    %c0_5 = arith.constant 0 : index
    %c0_6 = arith.constant 0 : index
    %6 = vector.load %arg1[%c0_4, %c0_5, %c0_6] : memref<1x16x128xbf16, #tpu.memory_space<vmem>>, vector<1x16x128xbf16>
    %7 = vector.shape_cast %6 : vector<1x16x128xbf16> to vector<16x128xbf16>
    %8 = arith.extf %7 : vector<16x128xbf16> to vector<16x128xf32>
    %c1 = arith.constant 1 : index
    %c0_7 = arith.constant 0 : index
    %9 = vector.load %arg8[%c1, %c0_7] : memref<18x128xf32, #tpu.memory_space<vmem>>, vector<16x128xf32>
    tpu.vector_store %arg8[%c1, %c0_7], %8 {strides = array<i32>} : memref<18x128xf32, #tpu.memory_space<vmem>>, vector<16x128xf32>,
    %c0_8 = arith.constant 0 : index
    %c0_9 = arith.constant 0 : index
    %10 = vector.load %arg8[%c0_8, %c0_9] : memref<18x128xf32, #tpu.memory_space<vmem>>, vector<16x128xf32>
    %11 = arith.truncf %10 : vector<16x128xf32> to vector<16x128xbf16>
    %c0_10 = arith.constant 0 : index
    %c0_11 = arith.constant 0 : index
    %c0_12 = arith.constant 0 : index
    %12 = vector.load %arg2[%c0_10, %c0_11, %c0_12] : memref<3x128x128xbf16, #tpu.memory_space<vmem>>, vector<1x128x128xbf16>
    %13 = vector.shape_cast %12 : vector<1x128x128xbf16> to vector<128x128xbf16>
    %cst_13 = arith.constant dense<0.000000e+00> : vector<16x128xf32>
    %14 = tpu.matmul %11, %13, %cst_13 {dimension_numbers = #tpu.dot_dimension_numbers<[1], [0], [0], [1], [0, 0, 1, 1], [], []>} : vector<16x128xbf16>, vector<128x128xbf16>, vector<16x128xf32> -> vector<16x128xf32>
    %15 = arith.addf %3, %14 : vector<16x128xf32>
    %c1_14 = arith.constant 1 : index
    %c0_15 = arith.constant 0 : index
    %16 = vector.load %arg8[%c1_14, %c0_15] : memref<18x128xf32, #tpu.memory_space<vmem>>, vector<16x128xf32>
    %17 = arith.truncf %16 : vector<16x128xf32> to vector<16x128xbf16>
    %c1_16 = arith.constant 1 : index
    %c0_17 = arith.constant 0 : index
    %c0_18 = arith.constant 0 : index
    %18 = vector.load %arg2[%c1_16, %c0_17, %c0_18] : memref<3x128x128xbf16, #tpu.memory_space<vmem>>, vector<1x128x128xbf16>
    %19 = vector.shape_cast %18 : vector<1x128x128xbf16> to vector<128x128xbf16>
    %cst_19 = arith.constant dense<0.000000e+00> : vector<16x128xf32>
    %20 = tpu.matmul %17, %19, %cst_19 {dimension_numbers = #tpu.dot_dimension_numbers<[1], [0], [0], [1], [0, 0, 1, 1], [], []>} : vector<16x128xbf16>, vector<128x128xbf16>, vector<16x128xf32> -> vector<16x128xf32>
    %21 = arith.addf %15, %20 : vector<16x128xf32>
    %c2 = arith.constant 2 : index
    %c0_20 = arith.constant 0 : index
    %22 = vector.load %arg8[%c2, %c0_20] : memref<18x128xf32, #tpu.memory_space<vmem>>, vector<16x128xf32>
    %23 = arith.truncf %22 : vector<16x128xf32> to vector<16x128xbf16>
    %c2_21 = arith.constant 2 : index
    %c0_22 = arith.constant 0 : index
    %c0_23 = arith.constant 0 : index
    %24 = vector.load %arg2[%c2_21, %c0_22, %c0_23] : memref<3x128x128xbf16, #tpu.memory_space<vmem>>, vector<1x128x128xbf16>
    %25 = vector.shape_cast %24 : vector<1x128x128xbf16> to vector<128x128xbf16>
    %cst_24 = arith.constant dense<0.000000e+00> : vector<16x128xf32>
    %26 = tpu.matmul %23, %25, %cst_24 {dimension_numbers = #tpu.dot_dimension_numbers<[1], [0], [0], [1], [0, 0, 1, 1], [], []>} : vector<16x128xbf16>, vector<128x128xbf16>, vector<16x128xf32> -> vector<16x128xf32>
    %27 = arith.addf %21, %26 : vector<16x128xf32>
    %cst_25 = arith.constant 0.000000e+00 : f32
    %28 = vector.broadcast %cst_25 : f32 to vector<18x64xf32>
    %c0_26 = arith.constant 0 : index
    %c0_27 = arith.constant 0 : index
    %29 = vector.load %arg9[%c0_26, %c0_27] : memref<18x64xf32, #tpu.memory_space<vmem>>, vector<18x64xf32>
    tpu.vector_store %arg9[%c0_26, %c0_27], %28 {strides = array<i32>} : memref<18x64xf32, #tpu.memory_space<vmem>>, vector<18x64xf32>,
    %c0_28 = arith.constant 0 : index
    %c0_29 = arith.constant 0 : index
    %c0_30 = arith.constant 0 : index
    %30 = vector.load %arg3[%c0_28, %c0_29, %c0_30] : memref<1x16x64xbf16, #tpu.memory_space<vmem>>, vector<1x16x64xbf16>
    %31 = vector.shape_cast %30 : vector<1x16x64xbf16> to vector<16x64xbf16>
    %32 = arith.extf %31 : vector<16x64xbf16> to vector<16x64xf32>
    %c1_31 = arith.constant 1 : index
    %c0_32 = arith.constant 0 : index
    %33 = vector.load %arg9[%c1_31, %c0_32] : memref<18x64xf32, #tpu.memory_space<vmem>>, vector<16x64xf32>
    tpu.vector_store %arg9[%c1_31, %c0_32], %32 {strides = array<i32>} : memref<18x64xf32, #tpu.memory_space<vmem>>, vector<16x64xf32>,
    %c0_33 = arith.constant 0 : index
    %c0_34 = arith.constant 0 : index
    %34 = vector.load %arg9[%c0_33, %c0_34] : memref<18x64xf32, #tpu.memory_space<vmem>>, vector<16x64xf32>
    %35 = arith.truncf %34 : vector<16x64xf32> to vector<16x64xbf16>
    %c0_35 = arith.constant 0 : index
    %c0_36 = arith.constant 0 : index
    %c0_37 = arith.constant 0 : index
    %36 = vector.load %arg4[%c0_35, %c0_36, %c0_37] : memref<3x64x128xbf16, #tpu.memory_space<vmem>>, vector<1x64x128xbf16>
    %37 = vector.shape_cast %36 : vector<1x64x128xbf16> to vector<64x128xbf16>
    %cst_38 = arith.constant dense<0.000000e+00> : vector<16x128xf32>
    %38 = tpu.matmul %35, %37, %cst_38 {dimension_numbers = #tpu.dot_dimension_numbers<[1], [0], [0], [1], [0, 0, 1, 1], [], []>} : vector<16x64xbf16>, vector<64x128xbf16>, vector<16x128xf32> -> vector<16x128xf32>
    %39 = arith.addf %27, %38 : vector<16x128xf32>
    %c1_39 = arith.constant 1 : index
    %c0_40 = arith.constant 0 : index
    %40 = vector.load %arg9[%c1_39, %c0_40] : memref<18x64xf32, #tpu.memory_space<vmem>>, vector<16x64xf32>
    %41 = arith.truncf %40 : vector<16x64xf32> to vector<16x64xbf16>
    %c1_41 = arith.constant 1 : index
    %c0_42 = arith.constant 0 : index
    %c0_43 = arith.constant 0 : index
    %42 = vector.load %arg4[%c1_41, %c0_42, %c0_43] : memref<3x64x128xbf16, #tpu.memory_space<vmem>>, vector<1x64x128xbf16>
    %43 = vector.shape_cast %42 : vector<1x64x128xbf16> to vector<64x128xbf16>
    %cst_44 = arith.constant dense<0.000000e+00> : vector<16x128xf32>
    %44 = tpu.matmul %41, %43, %cst_44 {dimension_numbers = #tpu.dot_dimension_numbers<[1], [0], [0], [1], [0, 0, 1, 1], [], []>} : vector<16x64xbf16>, vector<64x128xbf16>, vector<16x128xf32> -> vector<16x128xf32>
    %45 = arith.addf %39, %44 : vector<16x128xf32>
    %c2_45 = arith.constant 2 : index
    %c0_46 = arith.constant 0 : index
    %46 = vector.load %arg9[%c2_45, %c0_46] : memref<18x64xf32, #tpu.memory_space<vmem>>, vector<16x64xf32>
    %47 = arith.truncf %46 : vector<16x64xf32> to vector<16x64xbf16>
    %c2_47 = arith.constant 2 : index
    %c0_48 = arith.constant 0 : index
    %c0_49 = arith.constant 0 : index
    %48 = vector.load %arg4[%c2_47, %c0_48, %c0_49] : memref<3x64x128xbf16, #tpu.memory_space<vmem>>, vector<1x64x128xbf16>
    %49 = vector.shape_cast %48 : vector<1x64x128xbf16> to vector<64x128xbf16>
    %cst_50 = arith.constant dense<0.000000e+00> : vector<16x128xf32>
    %50 = tpu.matmul %47, %49, %cst_50 {dimension_numbers = #tpu.dot_dimension_numbers<[1], [0], [0], [1], [0, 0, 1, 1], [], []>} : vector<16x64xbf16>, vector<64x128xbf16>, vector<16x128xf32> -> vector<16x128xf32>
    %51 = arith.addf %45, %50 : vector<16x128xf32>
    %cst_51 = arith.constant 0.000000e+00 : f32
    %52 = vector.broadcast %cst_51 : f32 to vector<16x128xf32>
    %53 = arith.maximumf %51, %52 : vector<16x128xf32>
    %54 = arith.truncf %53 : vector<16x128xf32> to vector<16x128xbf16>
    %c0_52 = arith.constant 0 : index
    %c0_53 = arith.constant 0 : index
    %c0_54 = arith.constant 0 : index
    %55 = vector.load %arg6[%c0_52, %c0_53, %c0_54] : memref<1x16x128xbf16, #tpu.memory_space<vmem>>, vector<1x16x128xbf16>
    %56 = vector.shape_cast %55 : vector<1x16x128xbf16> to vector<16x128xbf16>
    %57 = vector.shape_cast %54 : vector<16x128xbf16> to vector<1x16x128xbf16>
    tpu.vector_store %arg6[%c0_52, %c0_53, %c0_54], %57 {strides = array<i32>} : memref<1x16x128xbf16, #tpu.memory_space<vmem>>, vector<1x16x128xbf16>,
    %cst_55 = arith.constant dense<0.000000e+00> : vector<128xf32>
    %58 = vector.multi_reduction <add>, %53, %cst_55 [0] : vector<16x128xf32> to vector<128xf32>
    %59 = vector.shape_cast %58 : vector<128xf32> to vector<1x128xf32>
    %c0_56 = arith.constant 0 : index
    %c0_57 = arith.constant 0 : index
    %c0_58 = arith.constant 0 : index
    %60 = vector.load %arg7[%c0_56, %c0_57, %c0_58] : memref<1x2x128xf32, #tpu.memory_space<vmem>>, vector<1x1x128xf32>
    %61 = vector.shape_cast %60 : vector<1x1x128xf32> to vector<1x128xf32>
    %62 = vector.shape_cast %59 : vector<1x128xf32> to vector<1x1x128xf32>
    tpu.vector_store %arg7[%c0_56, %c0_57, %c0_58], %62 {strides = array<i32>} : memref<1x2x128xf32, #tpu.memory_space<vmem>>, vector<1x1x128xf32>,
    %63 = arith.mulf %53, %53 : vector<16x128xf32>
    %cst_59 = arith.constant dense<0.000000e+00> : vector<128xf32>
    %64 = vector.multi_reduction <add>, %63, %cst_59 [0] : vector<16x128xf32> to vector<128xf32>
    %65 = vector.shape_cast %64 : vector<128xf32> to vector<1x128xf32>
    %c0_60 = arith.constant 0 : index
    %c1_61 = arith.constant 1 : index
    %c0_62 = arith.constant 0 : index
    %66 = vector.load %arg7[%c0_60, %c1_61, %c0_62] : memref<1x2x128xf32, #tpu.memory_space<vmem>>, vector<1x1x128xf32>
    %67 = vector.shape_cast %66 : vector<1x1x128xf32> to vector<1x128xf32>
    %68 = vector.shape_cast %65 : vector<1x128xf32> to vector<1x1x128xf32>
    tpu.vector_store %arg7[%c0_60, %c1_61, %c0_62], %68 {strides = array<i32>} : memref<1x2x128xf32, #tpu.memory_space<vmem>>, vector<1x1x128xf32>,
    return
  }
  func.func @transform_0(%arg0: i32) -> (i32, i32, i32) {
    %c0_i32 = arith.constant 0 : i32
    %c0_i32_0 = arith.constant 0 : i32
    %c0_i32_1 = arith.constant 0 : i32
    return %arg0, %c0_i32, %c0_i32_0 : i32, i32, i32
  }
  func.func @transform_1(%arg0: i32) -> (i32, i32, i32) {
    %c0_i32 = arith.constant 0 : i32
    %c0_i32_0 = arith.constant 0 : i32
    %c0_i32_1 = arith.constant 0 : i32
    %c0_i32_2 = arith.constant 0 : i32
    return %c0_i32, %c0_i32_0, %c0_i32_1 : i32, i32, i32
  }
  func.func @transform_2(%arg0: i32) -> (i32, i32, i32) {
    %c0_i32 = arith.constant 0 : i32
    %c0_i32_0 = arith.constant 0 : i32
    %c0_i32_1 = arith.constant 0 : i32
    return %arg0, %c0_i32, %c0_i32_0 : i32, i32, i32
  }
  func.func @transform_3(%arg0: i32) -> (i32, i32, i32) {
    %c0_i32 = arith.constant 0 : i32
    %c0_i32_0 = arith.constant 0 : i32
    %c0_i32_1 = arith.constant 0 : i32
    %c0_i32_2 = arith.constant 0 : i32
    return %c0_i32, %c0_i32_0, %c0_i32_1 : i32, i32, i32
  }
  func.func @transform_4(%arg0: i32) -> (i32, i32) {
    %c0_i32 = arith.constant 0 : i32
    %c0_i32_0 = arith.constant 0 : i32
    %c0_i32_1 = arith.constant 0 : i32
    return %c0_i32, %c0_i32_0 : i32, i32
  }
  func.func @transform_5(%arg0: i32) -> (i32, i32, i32) {
    %c0_i32 = arith.constant 0 : i32
    %c0_i32_0 = arith.constant 0 : i32
    %c0_i32_1 = arith.constant 0 : i32
    return %arg0, %c0_i32, %c0_i32_0 : i32, i32, i32
  }
  func.func @transform_6(%arg0: i32) -> (i32, i32, i32) {
    %c0_i32 = arith.constant 0 : i32
    %c0_i32_0 = arith.constant 0 : i32
    %c0_i32_1 = arith.constant 0 : i32
    return %arg0, %c0_i32, %c0_i32_0 : i32, i32, i32
  }
}

module attributes {stable_mosaic.version = 11 : i64} {
  func.func @kernel(%arg0: i32, %arg1: memref<1x16x128xbf16, #tpu.memory_space<vmem>>, %arg2: memref<3x128x128xbf16, #tpu.memory_space<vmem>>, %arg3: memref<1x128xf32, #tpu.memory_space<vmem>>, %arg4: memref<1x16x128xbf16, #tpu.memory_space<vmem>>, %arg5: memref<1x2x128xf32, #tpu.memory_space<vmem>>, %arg6: memref<18x128xf32, #tpu.memory_space<vmem>>) attributes {dimension_semantics = [#tpu.dimension_semantics<parallel>], iteration_bounds = array<i64: 2>, scalar_prefetch = 0 : i64, scratch_operands = 1 : i64, tpu.core_type = #tpu.core_type<tc>, window_params = [{transform_indices = @transform_0, window_bounds = array<i64: 1, 16, 128>}, {pipeline_mode = #tpu.pipeline_mode<synchronous>, transform_indices = @transform_1, window_bounds = array<i64: 3, 128, 128>}, {pipeline_mode = #tpu.pipeline_mode<synchronous>, transform_indices = @transform_2, window_bounds = array<i64: 1, 128>}, {transform_indices = @transform_3, window_bounds = array<i64: 1, 16, 128>}, {transform_indices = @transform_4, window_bounds = array<i64: 1, 2, 128>}]} {
    %cst = arith.constant 0.000000e+00 : f32
    %0 = vector.broadcast %cst : f32 to vector<16x128xf32>
    %c0 = arith.constant 0 : index
    %c0_0 = arith.constant 0 : index
    %1 = vector.load %arg3[%c0, %c0_0] : memref<1x128xf32, #tpu.memory_space<vmem>>, vector<1x128xf32>
    %2 = vector.broadcast %1 : vector<1x128xf32> to vector<16x128xf32>
    %3 = arith.addf %0, %2 : vector<16x128xf32>
    %cst_1 = arith.constant 0.000000e+00 : f32
    %4 = vector.broadcast %cst_1 : f32 to vector<18x128xf32>
    %c0_2 = arith.constant 0 : index
    %c0_3 = arith.constant 0 : index
    %5 = vector.load %arg6[%c0_2, %c0_3] : memref<18x128xf32, #tpu.memory_space<vmem>>, vector<18x128xf32>
    tpu.vector_store %arg6[%c0_2, %c0_3], %4 {strides = array<i32>} : memref<18x128xf32, #tpu.memory_space<vmem>>, vector<18x128xf32>,
    %c0_4 = arith.constant 0 : index
    %c0_5 = arith.constant 0 : index
    %c0_6 = arith.constant 0 : index
    %6 = vector.load %arg1[%c0_4, %c0_5, %c0_6] : memref<1x16x128xbf16, #tpu.memory_space<vmem>>, vector<1x16x128xbf16>
    %7 = vector.shape_cast %6 : vector<1x16x128xbf16> to vector<16x128xbf16>
    %8 = arith.extf %7 : vector<16x128xbf16> to vector<16x128xf32>
    %c1 = arith.constant 1 : index
    %c0_7 = arith.constant 0 : index
    %9 = vector.load %arg6[%c1, %c0_7] : memref<18x128xf32, #tpu.memory_space<vmem>>, vector<16x128xf32>
    tpu.vector_store %arg6[%c1, %c0_7], %8 {strides = array<i32>} : memref<18x128xf32, #tpu.memory_space<vmem>>, vector<16x128xf32>,
    %c0_8 = arith.constant 0 : index
    %c0_9 = arith.constant 0 : index
    %10 = vector.load %arg6[%c0_8, %c0_9] : memref<18x128xf32, #tpu.memory_space<vmem>>, vector<16x128xf32>
    %11 = arith.truncf %10 : vector<16x128xf32> to vector<16x128xbf16>
    %c0_10 = arith.constant 0 : index
    %c0_11 = arith.constant 0 : index
    %c0_12 = arith.constant 0 : index
    %12 = vector.load %arg2[%c0_10, %c0_11, %c0_12] : memref<3x128x128xbf16, #tpu.memory_space<vmem>>, vector<1x128x128xbf16>
    %13 = vector.shape_cast %12 : vector<1x128x128xbf16> to vector<128x128xbf16>
    %cst_13 = arith.constant dense<0.000000e+00> : vector<16x128xf32>
    %14 = tpu.matmul %11, %13, %cst_13 {dimension_numbers = #tpu.dot_dimension_numbers<[1], [0], [0], [1], [0, 0, 1, 1], [], []>} : vector<16x128xbf16>, vector<128x128xbf16>, vector<16x128xf32> -> vector<16x128xf32>
    %15 = arith.addf %3, %14 : vector<16x128xf32>
    %c1_14 = arith.constant 1 : index
    %c0_15 = arith.constant 0 : index
    %16 = vector.load %arg6[%c1_14, %c0_15] : memref<18x128xf32, #tpu.memory_space<vmem>>, vector<16x128xf32>
    %17 = arith.truncf %16 : vector<16x128xf32> to vector<16x128xbf16>
    %c1_16 = arith.constant 1 : index
    %c0_17 = arith.constant 0 : index
    %c0_18 = arith.constant 0 : index
    %18 = vector.load %arg2[%c1_16, %c0_17, %c0_18] : memref<3x128x128xbf16, #tpu.memory_space<vmem>>, vector<1x128x128xbf16>
    %19 = vector.shape_cast %18 : vector<1x128x128xbf16> to vector<128x128xbf16>
    %cst_19 = arith.constant dense<0.000000e+00> : vector<16x128xf32>
    %20 = tpu.matmul %17, %19, %cst_19 {dimension_numbers = #tpu.dot_dimension_numbers<[1], [0], [0], [1], [0, 0, 1, 1], [], []>} : vector<16x128xbf16>, vector<128x128xbf16>, vector<16x128xf32> -> vector<16x128xf32>
    %21 = arith.addf %15, %20 : vector<16x128xf32>
    %c2 = arith.constant 2 : index
    %c0_20 = arith.constant 0 : index
    %22 = vector.load %arg6[%c2, %c0_20] : memref<18x128xf32, #tpu.memory_space<vmem>>, vector<16x128xf32>
    %23 = arith.truncf %22 : vector<16x128xf32> to vector<16x128xbf16>
    %c2_21 = arith.constant 2 : index
    %c0_22 = arith.constant 0 : index
    %c0_23 = arith.constant 0 : index
    %24 = vector.load %arg2[%c2_21, %c0_22, %c0_23] : memref<3x128x128xbf16, #tpu.memory_space<vmem>>, vector<1x128x128xbf16>
    %25 = vector.shape_cast %24 : vector<1x128x128xbf16> to vector<128x128xbf16>
    %cst_24 = arith.constant dense<0.000000e+00> : vector<16x128xf32>
    %26 = tpu.matmul %23, %25, %cst_24 {dimension_numbers = #tpu.dot_dimension_numbers<[1], [0], [0], [1], [0, 0, 1, 1], [], []>} : vector<16x128xbf16>, vector<128x128xbf16>, vector<16x128xf32> -> vector<16x128xf32>
    %27 = arith.addf %21, %26 : vector<16x128xf32>
    %cst_25 = arith.constant 0.000000e+00 : f32
    %28 = vector.broadcast %cst_25 : f32 to vector<16x128xf32>
    %29 = arith.maximumf %27, %28 : vector<16x128xf32>
    %30 = arith.truncf %29 : vector<16x128xf32> to vector<16x128xbf16>
    %c0_26 = arith.constant 0 : index
    %c0_27 = arith.constant 0 : index
    %c0_28 = arith.constant 0 : index
    %31 = vector.load %arg4[%c0_26, %c0_27, %c0_28] : memref<1x16x128xbf16, #tpu.memory_space<vmem>>, vector<1x16x128xbf16>
    %32 = vector.shape_cast %31 : vector<1x16x128xbf16> to vector<16x128xbf16>
    %33 = vector.shape_cast %30 : vector<16x128xbf16> to vector<1x16x128xbf16>
    tpu.vector_store %arg4[%c0_26, %c0_27, %c0_28], %33 {strides = array<i32>} : memref<1x16x128xbf16, #tpu.memory_space<vmem>>, vector<1x16x128xbf16>,
    %cst_29 = arith.constant dense<0.000000e+00> : vector<128xf32>
    %34 = vector.multi_reduction <add>, %29, %cst_29 [0] : vector<16x128xf32> to vector<128xf32>
    %35 = vector.shape_cast %34 : vector<128xf32> to vector<1x128xf32>
    %c0_30 = arith.constant 0 : index
    %c0_31 = arith.constant 0 : index
    %c0_32 = arith.constant 0 : index
    %36 = vector.load %arg5[%c0_30, %c0_31, %c0_32] : memref<1x2x128xf32, #tpu.memory_space<vmem>>, vector<1x1x128xf32>
    %37 = vector.shape_cast %36 : vector<1x1x128xf32> to vector<1x128xf32>
    %38 = vector.shape_cast %35 : vector<1x128xf32> to vector<1x1x128xf32>
    tpu.vector_store %arg5[%c0_30, %c0_31, %c0_32], %38 {strides = array<i32>} : memref<1x2x128xf32, #tpu.memory_space<vmem>>, vector<1x1x128xf32>,
    %39 = arith.mulf %29, %29 : vector<16x128xf32>
    %cst_33 = arith.constant dense<0.000000e+00> : vector<128xf32>
    %40 = vector.multi_reduction <add>, %39, %cst_33 [0] : vector<16x128xf32> to vector<128xf32>
    %41 = vector.shape_cast %40 : vector<128xf32> to vector<1x128xf32>
    %c0_34 = arith.constant 0 : index
    %c1_35 = arith.constant 1 : index
    %c0_36 = arith.constant 0 : index
    %42 = vector.load %arg5[%c0_34, %c1_35, %c0_36] : memref<1x2x128xf32, #tpu.memory_space<vmem>>, vector<1x1x128xf32>
    %43 = vector.shape_cast %42 : vector<1x1x128xf32> to vector<1x128xf32>
    %44 = vector.shape_cast %41 : vector<1x128xf32> to vector<1x1x128xf32>
    tpu.vector_store %arg5[%c0_34, %c1_35, %c0_36], %44 {strides = array<i32>} : memref<1x2x128xf32, #tpu.memory_space<vmem>>, vector<1x1x128xf32>,
    return
  }
  func.func @transform_0(%arg0: i32) -> (i32, i32, i32) {
    %c0_i32 = arith.constant 0 : i32
    %c0_i32_0 = arith.constant 0 : i32
    %c0_i32_1 = arith.constant 0 : i32
    return %arg0, %c0_i32, %c0_i32_0 : i32, i32, i32
  }
  func.func @transform_1(%arg0: i32) -> (i32, i32, i32) {
    %c0_i32 = arith.constant 0 : i32
    %c0_i32_0 = arith.constant 0 : i32
    %c0_i32_1 = arith.constant 0 : i32
    %c0_i32_2 = arith.constant 0 : i32
    return %c0_i32, %c0_i32_0, %c0_i32_1 : i32, i32, i32
  }
  func.func @transform_2(%arg0: i32) -> (i32, i32) {
    %c0_i32 = arith.constant 0 : i32
    %c0_i32_0 = arith.constant 0 : i32
    %c0_i32_1 = arith.constant 0 : i32
    return %c0_i32, %c0_i32_0 : i32, i32
  }
  func.func @transform_3(%arg0: i32) -> (i32, i32, i32) {
    %c0_i32 = arith.constant 0 : i32
    %c0_i32_0 = arith.constant 0 : i32
    %c0_i32_1 = arith.constant 0 : i32
    return %arg0, %c0_i32, %c0_i32_0 : i32, i32, i32
  }
  func.func @transform_4(%arg0: i32) -> (i32, i32, i32) {
    %c0_i32 = arith.constant 0 : i32
    %c0_i32_0 = arith.constant 0 : i32
    %c0_i32_1 = arith.constant 0 : i32
    return %arg0, %c0_i32, %c0_i32_0 : i32, i32, i32
  }
}

</mosaic_0001>

<bundles_post_ra>
// kernel: tile.18
= control target key start
LH: loop header
LB: loop body
LE: loop exit
PB: predicated region body
PF: predicated region fallthrough
CT: control target
= control target key end

     0   :  { %s40_s0 = inlined_call_operand.vmem [shape: f32[8], index: 0, kind: input, shape index: {}]   ;;  %s41_s1 = inlined_call_operand.vmem [shape: f32[32,8], index: 1, kind: output, shape index: {}]  }
   0x1   :  { %v4_v0 = vld [vmem:[%s40_s0] ss:$0 sm:$0xff] }
   0x2   :  { %5 = vst [vmem:[%s41_s1] sm:$0xff] %v4_v0  ;;  %12 = vst [vmem:[%s41_s1 + $0x8] sm:$0xff] %v4_v0 }
   0x3   :  { %13 = vst [vmem:[%s41_s1 + $0x10] sm:$0xff] %v4_v0  ;;  %14 = vst [vmem:[%s41_s1 + $0x18] sm:$0xff] %v4_v0 }

// kernel: tile.19
= control target key start
LH: loop header
LB: loop body
LE: loop exit
PB: predicated region body
PF: predicated region fallthrough
CT: control target
= control target key end

     0   :  { %s7_s6 = smov 3  ;;  %s21_s9 = smov 3  ;;  %vm4_vm0 = vcmask 64512   ;;  %vm11_vm1 = vcmask 1048512   ;;  %vm18_vm2 = vcmask 982912   ;;  %vm25_vm3 = vcmask 917312   ;;  %s235_s0 = inlined_call_operand.vmem [shape: f32[32,8], index: 0, kind: input, shape index: {}]   ;;  %s236_s1 = inlined_call_operand.vmem [shape: f32[1,256], index: 1, kind: output, shape index: {}]  }
   0x1   :  { %v125_v0 = vld [vmem:[%s235_s0 + $0xf] ss:$16 sm:%s7_s6]   ;;  %s156_s10 = smov 120   ;;  %v127_v1 = vld [vmem:[%s235_s0 + $0xd] ss:$16 sm:%s21_s9]   ;;  %s14_s13 = smov 3 }
   0x2   :  { %9 = vrot.lane.b32.xlu0 %v125_v0, %s156_s10  ;;  %s157_s14 = smov 104   ;;  %v126_v2 = vld [vmem:[%s235_s0 + $0xe] ss:$16 sm:%s14_s13]   ;;  %s28_s17 = smov 3  ;;  %vm32_vm4 = vcmask 851712   ;;  %vm39_vm5 = vcmask 786112  }
   0x3   :  { %23 = vrot.lane.b32.xlu1 %v127_v1, %s157_s14  ;;  %v128_v3 = vld [vmem:[%s235_s0 + $0xc] ss:$16 sm:%s28_s17]   ;;  %s35_s20 = smov 3  ;;  %s42_s21 = smov 3  ;;  %vm46_vm6 = vcmask 720512   ;;  %vm53_vm7 = vcmask 654912  }
   0x4   :  { %s158_s22 = smov 112   ;;  %s159_s23 = smov 96   ;;  %v129_v4 = vld [vmem:[%s235_s0 + $0xb] ss:$16 sm:%s35_s20]   ;;  %v130_v5 = vld [vmem:[%s235_s0 + $0xa] ss:$16 sm:%s42_s21]  }
   0x5   :  { %s49_s28 = smov 3  ;;  %s56_s29 = smov 3  ;;  %vm60_vm8 = vcmask 589312   ;;  %vm67_vm9 = vcmask 523712   ;;  %vm74_vm10 = vcmask 458112   ;;  %vm81_vm11 = vcmask 392512  }
   0x6   :  { %16 = vrot.lane.b32.xlu0 %v126_v2, %s158_s22  ;;  %s160_s30 = smov 88   ;;  %s161_s2 = smov 80   ;;  %v131_v6 = vld [vmem:[%s235_s0 + $0x9] ss:$16 sm:%s49_s28]   ;;  %vm88_vm12 = vcmask 326912   ;;  %vm95_vm13 = vcmask 261312  }
   0x7   :  { %30 = vrot.lane.b32.xlu1 %v128_v3, %s159_s23  ;;  %v132_v7 = vld [vmem:[%s235_s0 + $0x8] ss:$16 sm:%s56_s29]   ;;  %s63_s7 = smov 3  ;;  %s70_s8 = smov 3  ;;  %vm102_vm14 = vcmask 195712   ;;  %vm109_vm15 = vcmask 130112  }
   0x8   :  { %s162_s9 = smov 72   ;;  %s163_s10 = smov 64   ;;  %v133_v8 = vld [vmem:[%s235_s0 + $0x7] ss:$16 sm:%s63_s7]   ;;  %v134_v9 = vld [vmem:[%s235_s0 + $0x6] ss:$16 sm:%s70_s8]  }
   0x9   :  { %s2_s13 = smov 3  ;;  %s77_s16 = smov 3 }
   0xa   :  { %37 = vrot.lane.b32.xlu0 %v129_v4, %s160_s30  ;;  %v3_v10 = vld [vmem:[%s235_s0] ss:$16 sm:%s2_s13]   ;;  %s84_s19 = smov 3  ;;  %s164_s20 = smov 56  }
   0xb   :  { %44 = vrot.lane.b32.xlu1 %v130_v5, %s161_s2  ;;  %5 = vst.msk [vmem:[#allocation0] ss:$8 sm:$0x3] %vm4_vm0, %v3_v10   ;;  %s165_s21 = smov 48   ;;  %v135_v11 = vld [vmem:[%s235_s0 + $0x5] ss:$16 sm:%s77_s16]  }
   0xc   :  { %v136_v12 = vld [vmem:[%s235_s0 + $0x4] ss:$16 sm:%s84_s19]   ;;  %s91_s26 = smov 3  ;;  %s98_s27 = smov 3 }
   0xd   :  { %s166_s28 = smov 40   ;;  %s167_s29 = smov 32   ;;  %v137_v13 = vld [vmem:[%s235_s0 + $0x3] ss:$16 sm:%s91_s26]   ;;  %v138_v14 = vld [vmem:[%s235_s0 + $0x2] ss:$16 sm:%s98_s27]  }
   0xe   :  { %51 = vrot.lane.b32.xlu0 %v131_v6, %s162_s9  ;;  %s105_s5 = smov 3  ;;  %s168_s6 = smov 24  }
   0xf   :  { %58 = vrot.lane.b32.xlu1 %v132_v7, %s163_s10  ;;  %s169_s7 = smov 16   ;;  %v139_v15 = vld [vmem:[%s235_s0 + $0x1] ss:$16 sm:%s105_s5]   ;;  %s170_s0 = smov 8  }
  0x12   :  { %65 = vrot.lane.b32.xlu0 %v133_v8, %s164_s20 }
  0x13   :  { %72 = vrot.lane.b32.xlu1 %v134_v9, %s165_s21 }
  0x16   :  { %79 = vrot.lane.b32.xlu0 %v135_v11, %s166_s28 }
  0x17   :  { %86 = vrot.lane.b32.xlu1 %v136_v12, %s167_s29 }
  0x1a   :  { %93 = vrot.lane.b32.xlu0 %v137_v13, %s168_s6 }
  0x1b   :  { %100 = vrot.lane.b32.xlu1 %v138_v14, %s169_s7 }
  0x1e   :  { %107 = vrot.lane.b32.xlu0 %v139_v15, %s170_s0 }
  0x74   :  { %v10_v16 = vpop.permute.xlu0 %9  }
  0x75   :  { %12 = vst.msk [vmem:[#allocation0] ss:$8 sm:$0x3] %vm11_vm1, %v10_v16   ;;  %v24_v17 = vpop.permute.xlu1 %23  }
  0x78   :  { %v17_v18 = vpop.permute.xlu0 %16  }
  0x79   :  { %19 = vst.msk [vmem:[#allocation0] ss:$8 sm:$0x3] %vm18_vm2, %v17_v18   ;;  %v31_v19 = vpop.permute.xlu1 %30  }
  0x7a   :  { %26 = vst.msk [vmem:[#allocation0] ss:$8 sm:$0x3] %vm25_vm3, %v24_v17  }
  0x7b   :  { %33 = vst.msk [vmem:[#allocation0] ss:$8 sm:$0x3] %vm32_vm4, %v31_v19  }
  0x7c   :  { %v38_v20 = vpop.permute.xlu0 %37  }
  0x7d   :  { %40 = vst.msk [vmem:[#allocation0] ss:$8 sm:$0x3] %vm39_vm5, %v38_v20   ;;  %v45_v21 = vpop.permute.xlu1 %44  }
  0x7e   :  { %47 = vst.msk [vmem:[#allocation0] ss:$8 sm:$0x3] %vm46_vm6, %v45_v21  }
  0x80   :  { %v52_v22 = vpop.permute.xlu0 %51  }
  0x81   :  { %54 = vst.msk [vmem:[#allocation0] ss:$8 sm:$0x3] %vm53_vm7, %v52_v22   ;;  %v59_v23 = vpop.permute.xlu1 %58  }
  0x82   :  { %61 = vst.msk [vmem:[#allocation0] ss:$8 sm:$0x3] %vm60_vm8, %v59_v23  }
  0x84   :  { %v66_v24 = vpop.permute.xlu0 %65  }
  0x85   :  { %68 = vst.msk [vmem:[#allocation0] ss:$8 sm:$0x3] %vm67_vm9, %v66_v24   ;;  %v73_v25 = vpop.permute.xlu1 %72  }
  0x86   :  { %75 = vst.msk [vmem:[#allocation0] ss:$8 sm:$0x3] %vm74_vm10, %v73_v25  }
  0x88   :  { %v80_v26 = vpop.permute.xlu0 %79  }
  0x89   :  { %82 = vst.msk [vmem:[#allocation0] ss:$8 sm:$0x3] %vm81_vm11, %v80_v26   ;;  %v87_v27 = vpop.permute.xlu1 %86  }
  0x8a   :  { %89 = vst.msk [vmem:[#allocation0] ss:$8 sm:$0x3] %vm88_vm12, %v87_v27  }
  0x8c   :  { %v94_v28 = vpop.permute.xlu0 %93  }
  0x8d   :  { %96 = vst.msk [vmem:[#allocation0] ss:$8 sm:$0x3] %vm95_vm13, %v94_v28   ;;  %v101_v29 = vpop.permute.xlu1 %100  }
  0x8e   :  { %103 = vst.msk [vmem:[#allocation0] ss:$8 sm:$0x3] %vm102_vm14, %v101_v29  }
  0x90   :  { %v108_v30 = vpop.permute.xlu0 %107  }
  0x91   :  { %110 = vst.msk [vmem:[#allocation0] ss:$8 sm:$0x3] %vm109_vm15, %v108_v30  }
  0x98   :  { %v115_v31 = vld [vmem:[#allocation0] sm:$0x1]  ;;  %v120_v32 = vld [vmem:[#allocation0 + $0x8] sm:$0x1] }
  0x99   :  { %118 = vst [vmem:[%s236_s1] sm:$0x1] %v115_v31  ;;  %140 = vst [vmem:[%s236_s1 + $0x1] sm:$0x1] %v120_v32 }

// kernel: unet_block_up.3
= control target key start
LH: loop header
LB: loop body
LE: loop exit
PB: predicated region body
PF: predicated region fallthrough
CT: control target
= control target key end

     0   :  { %s566_s15 = smov 0   ;;  %s621_s0 = inlined_call_operand.vmem [shape: bf16[2,8,64], index: 0, kind: input, shape index: {}]   ;;  %s622_s1 = inlined_call_operand.vmem [shape: bf16[64,256], index: 1, kind: input, shape index: {}]   ;;  %s623_s2 = inlined_call_operand.vmem [shape: f32[1,256], index: 2, kind: input, shape index: {}]   ;;  %s624_s3 = inlined_call_operand.vmem [shape: bf16[2,8,256], index: 3, kind: output, shape index: {0}]   ;;  %s625_s4 = inlined_call_operand.vmem [shape: f32[2,2,256], index: 4, kind: output, shape index: {1}]  }
   0x1 LB: > { %s483_s16 = sadd.s32 4294967295, %s537_s15   ;;  %p487_p0 = scmp.ge.s32.totalorder %s537_s15, 1  ;;  %s537_s15 = sphi %s566_s15, %s15_s15  }
   0x2   : > { %p164_p1 = scmp.lt.s32.totalorder %s537_s15, 3 }
   0x4   : > { %p165_p2 = pnand %p487_p0, %p164_p1 }
   0x5   : > { %p194_p3 = scmp.lt.s32.totalorder (!%p165_p2), %s483_s16, 1 }
   0x6   : > { %168 = sbr.rel (%p165_p2) target bundleno = 249 (0xf9), region = 32 }
   0xb   : > { %v519_v0 = vld [vmem:[%s622_s1 + $0x34] ss:$8 sps:$4 sm:$0xff]   ;;  %v521_v1 = vld [vmem:[%s622_s1 + $0x30] ss:$8 sps:$4 sm:$0xff]   ;;  %v539_v2 = vmov 0   ;;  %s627_s16 = smov (!%p194_p3, %s483_s16), 1  ;;  %v220_v10 = vlaneseq }
   0xc   : > { %306 = vmatprep.mubr.bf16.mxu0 %v539_v2  ;;  %282 = vmatprep.subr.bf16.mxu0 %v519_v0  ;;  %v522_v3 = vld [vmem:[%s622_s1 + $0x24] ss:$8 sps:$4 sm:$0xff]   ;;  %v524_v4 = vld [vmem:[%s622_s1 + $0x20] ss:$8 sps:$4 sm:$0xff]   ;;  %v525_v5 = vld [vmem:[%s622_s1 + $0x14] ss:$8 sps:$4 sm:$0xff]  }
   0xd   : > { %283 = vmatpush1.bf16.msra.mxu0 %v521_v1  ;;  %v527_v6 = vld [vmem:[%s622_s1 + $0x10] ss:$8 sps:$4 sm:$0xff]   ;;  %v528_v7 = vld [vmem:[%s622_s1 + $0x4] ss:$8 sps:$4 sm:$0xff]   ;;  %s488_s5 = sshll.u32 %s627_s16, 2  ;;  %vm270_vm0 = vcmask 523264  }
   0xe   : > { %284 = vmatprep.subr.bf16.mxu0 %v522_v3  ;;  %v530_v8 = vld [vmem:[%s622_s1] ss:$8 sps:$4 sm:$0xff]   ;;  %s197_s10 = scalar_lea.vmem %s621_s0, %s488_s5  ;;  %v221_v11 = vshrl.u32 %v220_v10, 7  ;;  %s506_s13 = sshll.u32 %s627_s16, 3  ;;  %v540_v33 = vmov 1966171168  }
   0xf   : > { %v209_v9 = vld [vmem:[%s197_s10] sm:$0xf]  ;;  %s202_s18 = scalar_lea.vmem %s624_s3, %s506_s13  ;;  %v342_v34 = vunpack.c.l.s4 %v540_v33  ;;  %s207_s21 = scalar_lea.vmem %s625_s4, %s488_s5  ;;  %vm358_vm1 = vcmp.lt.s32.totalorder %v220_v10, 256 }
  0x10   : > { %v222_v12 = vsub.s32 0, %v221_v11  ;;  %v218_v13 = vld [vmem:[%s623_s2] sm:$0x3]  ;;  %v226_v14 = vsub.s32 1, %v221_v11 }
  0x11   : > { %285 = vmatpush1.bf16.msra.mxu0 %v524_v4  ;;  %v343_v43 = vunpack.c.0.s8 %v342_v34 }
  0x12   : > { %286 = vmatprep.subr.bf16.mxu0 %v525_v5  ;;  %v223_v15 = vrot.slane %v218_v13, %v222_v12  ;;  %v227_v16 = vrot.slane %v218_v13, %v226_v14 }
  0x13   : > { %v346_v51 = vsub.s32 %v343_v43, %v221_v11 }
  0x15   : > { %287 = vmatpush1.bf16.msra.mxu0 %v527_v6 }
  0x16   : > { %288 = vmatprep.subr.bf16.mxu0 %v528_v7 }
  0x19   : > { %289 = vmatpush1.bf16.msra.mxu0 %v530_v8 }
  0x1c   : > { %501 = vmatmul.mubr.msk.bf16.vlgmr.msra.gmra.mxu0 %vm270_vm0, %v209_v9 }
  0xdc   : > { %v308_v17 = vpop.f32.mrf.mxu0 }
  0xdd   : > { %v309_v18 = vadd.f32 %v308_v17, %v223_v15 }
  0xde   : > { %v310_v19 = vpop.f32.mrf.mxu0 }
  0xdf   : > { %v315_v20 = vmax.f32 %v309_v18, 0.0  ;;  %v311_v21 = vadd.f32 %v310_v19, %v227_v16 }
  0xe0   : > { %v312_v22 = vpop.f32.mrf.mxu0 }
  0xe1   : > { %v326_v23 = vrot.slane %v315_v20, 4  ;;  %v361_v24 = vmul.f32 %v315_v20, %v315_v20  ;;  %v316_v25 = vmax.f32 %v311_v21, 0.0 }
  0xe2   : > { %v313_v26 = vpop.f32.mrf.mxu0 }
  0xe3   : > { %v327_v27 = vadd.f32 %v326_v23, %v315_v20  ;;  %v363_v28 = vrot.slane %v361_v24, 4  ;;  %v508_v29 = vpack.c.bf16 %v316_v25, %v315_v20  ;;  %v332_v30 = vrot.slane %v316_v25, 4 }
  0xe4   : > { %v362_v31 = vmul.f32 %v316_v25, %v316_v25 }
  0xe5   : > { %v328_v32 = vrot.slane %v327_v27, 2  ;;  %v364_v35 = vadd.f32 %v363_v28, %v361_v24  ;;  %325 = vst [vmem:[%s202_s18] sm:$0xff] %v508_v29  ;;  %v333_v36 = vadd.f32 %v332_v30, %v316_v25 }
  0xe6   : > { %v369_v37 = vrot.slane %v362_v31, 4 }
  0xe7   : > { %v329_v38 = vadd.f32 %v328_v32, %v327_v27  ;;  %v365_v39 = vrot.slane %v364_v35, 2  ;;  %v334_v40 = vrot.slane %v333_v36, 2 }
  0xe8   : > { %v370_v41 = vadd.f32 %v369_v37, %v362_v31 }
  0xe9   : > { %v330_v42 = vrot.slane %v329_v38, 1  ;;  %v366_v44 = vadd.f32 %v365_v39, %v364_v35  ;;  %v335_v45 = vadd.f32 %v334_v40, %v333_v36 }
  0xea   : > { %v371_v46 = vrot.slane %v370_v41, 2 }
  0xeb   : > { %v336_v47 = vrot.slane %v335_v45, 1  ;;  %v367_v48 = vrot.slane %v366_v44, 1  ;;  %v331_v50 = vadd.f32 %v330_v42, %v329_v38 }
  0xec   : > { %v372_v49 = vadd.f32 %v371_v46, %v370_v41 }
  0xed   : > { %v337_v52 = vadd.f32 %v336_v47, %v335_v45  ;;  %v368_v55 = vadd.f32 %v367_v48, %v366_v44 }
  0xee   : > { %v373_v53 = vrot.slane %v372_v49, 1 }
  0xef   : > { %v340_v54 = vcombine.low %v331_v50, %v337_v52 }
  0xf0   : > { %v374_v56 = vadd.f32 %v373_v53, %v372_v49 }
  0xf1   : > { %v347_v57 = vrot.slane %v340_v54, %v346_v51 }
  0xf2   : > { %v377_v58 = vcombine.low %v368_v55, %v374_v56 }
  0xf3   : > { %v354_v59 = vrot.slane %v347_v57, %v346_v51 }
  0xf4   : > { %v384_v60 = vrot.slane %v377_v58, %v346_v51 }
  0xf5   : > { %360 = vst.msk [vmem:[%s207_s21] ss:$2 sm:$0x3] %vm358_vm1, %v354_v59 }
  0xf6   : > { %v391_v61 = vrot.slane %v384_v60, %v346_v51 }
  0xf8   : > { %503 = vst.msk [vmem:[%s207_s21 + $0x1] ss:$2 sm:$0x3] %vm358_vm1, %v391_v61 }
  0xf9 PF: > { %s15_s15 = sadd.s32 1, %s537_s15  }
  0xfa   : > { %p12_p4 = scmp.ge.s32.totalorder %s15_s15, 4  }
  0xfc   :  { %14 = sbr.rel (!%p12_p4) target bundleno = 1 (0x1), region = 75 }

// kernel: tile.23
= control target key start
LH: loop header
LB: loop body
LE: loop exit
PB: predicated region body
PF: predicated region fallthrough
CT: control target
= control target key end

     0   :  { %s28_s0 = inlined_call_operand.vmem [shape: f32[8], index: 0, kind: input, shape index: {}]   ;;  %s29_s1 = inlined_call_operand.vmem [shape: f32[16,8], index: 1, kind: output, shape index: {}]  }
   0x1   :  { %v4_v0 = vld [vmem:[%s28_s0] ss:$0 sm:$0xff] }
   0x2   :  { %5 = vst [vmem:[%s29_s1] sm:$0xff] %v4_v0  ;;  %8 = vst [vmem:[%s29_s1 + $0x8] sm:$0xff] %v4_v0 }

// kernel: tile.24
= control target key start
LH: loop header
LB: loop body
LE: loop exit
PB: predicated region body
PF: predicated region fallthrough
CT: control target
= control target key end

     0   :  { %s133_s10 = smov 120   ;;  %s134_s11 = smov 104   ;;  %vm3_vm0 = vcmask 64512   ;;  %vm9_vm1 = vcmask 1048512   ;;  %vm15_vm2 = vcmask 982912   ;;  %vm21_vm3 = vcmask 917312   ;;  %s209_s0 = inlined_call_operand.vmem [shape: f32[16,8], index: 0, kind: input, shape index: {}]   ;;  %s210_s1 = inlined_call_operand.vmem [shape: f32[1,128], index: 1, kind: output, shape index: {}]  }
   0x1   :  { %v103_v0 = vld [vmem:[%s209_s0 + $0xf] sm:$0x1]   ;;  %v105_v1 = vld [vmem:[%s209_s0 + $0xd] sm:$0x1]   ;;  %v104_v2 = vld [vmem:[%s209_s0 + $0xe] sm:$0x1]  }
   0x2   :  { %7 = vrot.lane.b32.xlu0 %v103_v0, %s133_s10  ;;  %19 = vrot.lane.b32.xlu1 %v105_v1, %s134_s11  ;;  %v106_v3 = vld [vmem:[%s209_s0 + $0xc] sm:$0x1]   ;;  %s135_s16 = smov 112   ;;  %s136_s17 = smov 96   ;;  %v107_v4 = vld [vmem:[%s209_s0 + $0xb] sm:$0x1]  }
   0x3   :  { %v108_v5 = vld [vmem:[%s209_s0 + $0xa] sm:$0x1]   ;;  %v2_v6 = vld [vmem:[%s209_s0] sm:$0x1]   ;;  %s137_s24 = smov 88   ;;  %s138_s25 = smov 80  }
   0x4   :  { %4 = vst.msk [vmem:[#allocation0] sm:$0x1] %vm3_vm0, %v2_v6   ;;  %v109_v7 = vld [vmem:[%s209_s0 + $0x9] sm:$0x1]   ;;  %v110_v8 = vld [vmem:[%s209_s0 + $0x8] sm:$0x1]  }
   0x5   :  { %s139_s30 = smov 72   ;;  %s140_s2 = smov 64   ;;  %v111_v9 = vld [vmem:[%s209_s0 + $0x7] sm:$0x1]   ;;  %v112_v10 = vld [vmem:[%s209_s0 + $0x6] sm:$0x1]  }
   0x6   :  { %13 = vrot.lane.b32.xlu0 %v104_v2, %s135_s16  ;;  %25 = vrot.lane.b32.xlu1 %v106_v3, %s136_s17  ;;  %s141_s7 = smov 56   ;;  %s142_s8 = smov 48   ;;  %v113_v11 = vld [vmem:[%s209_s0 + $0x5] sm:$0x1]   ;;  %v114_v12 = vld [vmem:[%s209_s0 + $0x4] sm:$0x1]  }
   0x7   :  { %s143_s13 = smov 40   ;;  %s144_s14 = smov 32   ;;  %v115_v13 = vld [vmem:[%s209_s0 + $0x3] sm:$0x1]   ;;  %v116_v14 = vld [vmem:[%s209_s0 + $0x2] sm:$0x1]  }
   0x8   :  { %s145_s19 = smov 24   ;;  %s146_s20 = smov 16   ;;  %v117_v15 = vld [vmem:[%s209_s0 + $0x1] sm:$0x1]   ;;  %vm27_vm4 = vcmask 851712   ;;  %vm33_vm5 = vcmask 786112  }
   0x9   :  { %s147_s0 = smov 8   ;;  %vm39_vm6 = vcmask 720512   ;;  %vm45_vm7 = vcmask 654912   ;;  %vm51_vm8 = vcmask 589312   ;;  %vm57_vm9 = vcmask 523712  }
   0xa   :  { %31 = vrot.lane.b32.xlu0 %v107_v4, %s137_s24  ;;  %37 = vrot.lane.b32.xlu1 %v108_v5, %s138_s25  ;;  %vm63_vm10 = vcmask 458112   ;;  %vm69_vm11 = vcmask 392512   ;;  %vm75_vm12 = vcmask 326912   ;;  %vm81_vm13 = vcmask 261312  }
   0xb   :  { %vm87_vm14 = vcmask 195712   ;;  %vm93_vm15 = vcmask 130112  }
   0xe   :  { %43 = vrot.lane.b32.xlu0 %v109_v7, %s139_s30  ;;  %49 = vrot.lane.b32.xlu1 %v110_v8, %s140_s2 }
  0x12   :  { %55 = vrot.lane.b32.xlu0 %v111_v9, %s141_s7  ;;  %61 = vrot.lane.b32.xlu1 %v112_v10, %s142_s8 }
  0x16   :  { %67 = vrot.lane.b32.xlu0 %v113_v11, %s143_s13  ;;  %73 = vrot.lane.b32.xlu1 %v114_v12, %s144_s14 }
  0x1a   :  { %79 = vrot.lane.b32.xlu0 %v115_v13, %s145_s19  ;;  %85 = vrot.lane.b32.xlu1 %v116_v14, %s146_s20 }
  0x1e   :  { %91 = vrot.lane.b32.xlu0 %v117_v15, %s147_s0 }
  0x74   :  { %v8_v16 = vpop.permute.xlu0 %7   ;;  %v20_v17 = vpop.permute.xlu1 %19  }
  0x75   :  { %10 = vst.msk [vmem:[#allocation0] sm:$0x1] %vm9_vm1, %v8_v16  }
  0x78   :  { %v14_v18 = vpop.permute.xlu0 %13   ;;  %v26_v19 = vpop.permute.xlu1 %25  }
  0x79   :  { %16 = vst.msk [vmem:[#allocation0] sm:$0x1] %vm15_vm2, %v14_v18  }
  0x7a   :  { %22 = vst.msk [vmem:[#allocation0] sm:$0x1] %vm21_vm3, %v20_v17  }
  0x7b   :  { %28 = vst.msk [vmem:[#allocation0] sm:$0x1] %vm27_vm4, %v26_v19  }
  0x7c   :  { %v32_v20 = vpop.permute.xlu0 %31   ;;  %v38_v21 = vpop.permute.xlu1 %37  }
  0x7d   :  { %34 = vst.msk [vmem:[#allocation0] sm:$0x1] %vm33_vm5, %v32_v20  }
  0x7e   :  { %40 = vst.msk [vmem:[#allocation0] sm:$0x1] %vm39_vm6, %v38_v21  }
  0x80   :  { %v44_v22 = vpop.permute.xlu0 %43   ;;  %v50_v23 = vpop.permute.xlu1 %49  }
  0x81   :  { %46 = vst.msk [vmem:[#allocation0] sm:$0x1] %vm45_vm7, %v44_v22  }
  0x82   :  { %52 = vst.msk [vmem:[#allocation0] sm:$0x1] %vm51_vm8, %v50_v23  }
  0x84   :  { %v56_v24 = vpop.permute.xlu0 %55   ;;  %v62_v25 = vpop.permute.xlu1 %61  }
  0x85   :  { %58 = vst.msk [vmem:[#allocation0] sm:$0x1] %vm57_vm9, %v56_v24  }
  0x86   :  { %64 = vst.msk [vmem:[#allocation0] sm:$0x1] %vm63_vm10, %v62_v25  }
  0x88   :  { %v68_v26 = vpop.permute.xlu0 %67   ;;  %v74_v27 = vpop.permute.xlu1 %73  }
  0x89   :  { %70 = vst.msk [vmem:[#allocation0] sm:$0x1] %vm69_vm11, %v68_v26  }
  0x8a   :  { %76 = vst.msk [vmem:[#allocation0] sm:$0x1] %vm75_vm12, %v74_v27  }
  0x8c   :  { %v80_v28 = vpop.permute.xlu0 %79   ;;  %v86_v29 = vpop.permute.xlu1 %85  }
  0x8d   :  { %82 = vst.msk [vmem:[#allocation0] sm:$0x1] %vm81_vm13, %v80_v28  }
  0x8e   :  { %88 = vst.msk [vmem:[#allocation0] sm:$0x1] %vm87_vm14, %v86_v29  }
  0x90   :  { %v92_v30 = vpop.permute.xlu0 %91  }
  0x91   :  { %94 = vst.msk [vmem:[#allocation0] sm:$0x1] %vm93_vm15, %v92_v30  }
  0x98   :  { %v99_v31 = vld [vmem:[#allocation0] sm:$0x1] }
  0x99   :  { %102 = vst [vmem:[%s210_s1] sm:$0x1] %v99_v31 }

// kernel: unet_block_up.4
= control target key start
LH: loop header
LB: loop body
LE: loop exit
PB: predicated region body
PF: predicated region fallthrough
CT: control target
= control target key end

     0   :  { %s1369_s21 = smov 0   ;;  %s1577_s0 = inlined_call_operand.vmem [shape: bf16[2,16,128], index: 0, kind: input, shape index: {}]   ;;  %s1578_s1 = inlined_call_operand.vmem [shape: bf16[3,128,128], index: 1, kind: input, shape index: {}]   ;;  %s1579_s2 = inlined_call_operand.vmem [shape: bf16[2,16,64], index: 2, kind: input, shape index: {}]   ;;  %s1580_s3 = inlined_call_operand.vmem [shape: bf16[3,64,128], index: 3, kind: input, shape index: {}]   ;;  %s1581_s4 = inlined_call_operand.vmem [shape: f32[1,128], index: 4, kind: input, shape index: {}]   ;;  %s1582_s5 = inlined_call_operand.vmem [shape: bf16[2,16,128], index: 5, kind: output, shape index: {0}]   ;;  %s1583_s6 = inlined_call_operand.vmem [shape: f32[2,2,128], index: 6, kind: output, shape index: {1}]  }
   0x1 LB: > { %s1017_s22 = sadd.s32 4294967295, %s1330_s21   ;;  %p1021_p0 = scmp.ge.s32.totalorder %s1330_s21, 1  ;;  %s1330_s21 = sphi %s1369_s21, %s17_s21  }
   0x2   : > { %p225_p1 = scmp.lt.s32.totalorder %s1330_s21, 3 }
   0x4   : > { %p226_p2 = pnand %p1021_p0, %p225_p1 }
   0x5   : > { %p264_p3 = scmp.lt.s32.totalorder (!%p226_p2), %s1017_s22, 1 }
   0x6   : > { %229 = sbr.rel (%p226_p2) target bundleno = 310 (0x136), region = 40 }
   0xb   : > { %v1287_v0 = vld [vmem:[%s1578_s1 + $0x38] sm:$0xff]   ;;  %v1332_v1 = vmov 0.0   ;;  %v1289_v3 = vld [vmem:[%s1578_s1 + $0x30] sm:$0xff]   ;;  %vm1333_vm0 = vmmov 0   ;;  %vm633_vm1 = vcmask 523264   ;;  %vm636_vm2 = vcmask 517120  }
   0xc   : > { %1181 = vmatprep.subr.bf16.mxu0 %v1332_v1  ;;  %292 = vst [vmem:[#allocation2] sm:$0xff] %v1332_v1  ;;  %293 = vst [vmem:[#allocation2 + $0x8] sm:$0xff] %v1332_v1  ;;  %1201 = vmatprep.subr.bf16.mxu1 %v1332_v1  ;;  %v1288_v2 = vld [vmem:[%s1578_s1 + $0x78] sm:$0xff]   ;;  %v1290_v4 = vld [vmem:[%s1578_s1 + $0x70] sm:$0xff]   ;;  %s1585_s22 = smov (!%p264_p3, %s1017_s22), 1 }
   0xd   : > { %294 = vst [vmem:[#allocation2 + $0x10] sm:$0x3] %v1332_v1  ;;  %1182 = vmatpush3.bf16.msra.mxu0 %v1287_v0  ;;  %1197 = vmatprep.mubr.msk.bf16.mxu0 %vm1333_vm0, %v1332_v1  ;;  %634 = vst.msk [vmem:[#allocation3] sm:$0xff] %vm633_vm1, %v1332_v1  ;;  %v1291_v5 = vld [vmem:[%s1578_s1 + $0x28] sm:$0xff]   ;;  %v1293_v7 = vld [vmem:[%s1578_s1 + $0x20] sm:$0xff]   ;;  %s1419_s13 = sshll.u32 %s1585_s22, 3 }
   0xe   : > { %1202 = vmatpush3.bf16.msra.mxu1 %v1288_v2  ;;  %1183 = vmatprep.subr.bf16.mxu0 %v1332_v1  ;;  %635 = vst.msk [vmem:[#allocation3 + $0x8] sm:$0xff] %vm633_vm1, %v1332_v1  ;;  %v1292_v6 = vld [vmem:[%s1578_s1 + $0x68] sm:$0xff]   ;;  %v1294_v8 = vld [vmem:[%s1578_s1 + $0x60] sm:$0xff]   ;;  %s1430_s18 = scalar_lea.vmem %s1577_s0, %s1419_s13  ;;  %v1295_v9 = vld [vmem:[%s1578_s1 + $0x18] sm:$0xff]   ;;  %s273_s11 = scalar_lea.vmem %s1579_s2, %s1419_s13 }
   0xf   : > { %1203 = vmatprep.subr.bf16.mxu1 %v1332_v1  ;;  %1217 = vmatprep.mubr.msk.bf16.mxu1 %vm1333_vm0, %v1332_v1  ;;  %637 = vst.msk [vmem:[#allocation3 + $0x10] sm:$0x3] %vm636_vm2, %v1332_v1  ;;  %v1296_v10 = vld [vmem:[%s1578_s1 + $0x58] sm:$0xff]   ;;  %v1127_v11 = vld [vmem:[%s1430_s18] sm:$0xff]   ;;  %v1297_v14 = vld [vmem:[%s1578_s1 + $0x10] sm:$0xff]   ;;  %s278_s20 = scalar_lea.vmem %s1582_s5, %s1419_s13  ;;  %s1028_s23 = sshll.u32 %s1585_s22, 1 }
  0x10   : > { %v1128_v12 = vunpack.c.l.bf16 %v1127_v11  ;;  %v1129_v13 = vunpack.c.h.bf16 %v1127_v11  ;;  %v1298_v15 = vld [vmem:[%s1578_s1 + $0x50] sm:$0xff]   ;;  %v1299_v16 = vld [vmem:[%s1578_s1 + $0x8] sm:$0xff]   ;;  %v1301_v18 = vld [vmem:[%s1578_s1] sm:$0xff]   ;;  %s282_s13 = scalar_lea.vmem %s1583_s6, %s1028_s23 }
  0x11   : > { %1184 = vmatpush3.bf16.msra.mxu0 %v1289_v3  ;;  %v1300_v17 = vld [vmem:[%s1578_s1 + $0x48] sm:$0xff]   ;;  %v1302_v21 = vld [vmem:[%s1578_s1 + $0x40] sm:$0xff]   ;;  %v1303_v26 = vld [vmem:[%s1578_s1 + $0xb8] sm:$0xff]  }
  0x12   : > { %1204 = vmatpush3.bf16.msra.mxu1 %v1290_v4  ;;  %1185 = vmatprep.subr.bf16.mxu0 %v1332_v1  ;;  %299 = vst [vmem:[#allocation2 + $0x1] sm:$0xff] %v1128_v12  ;;  %300 = vst [vmem:[#allocation2 + $0x9] sm:$0xff] %v1129_v13  ;;  %v1131_v22 = vld [vmem:[%s273_s11] sm:$0xff]   ;;  %v1306_v28 = vld [vmem:[%s1580_s3 + $0x18] sm:$0xff]  }
  0x13   : > { %1205 = vmatprep.subr.bf16.mxu1 %v1332_v1  ;;  %v1132_v23 = vunpack.c.l.bf16 %v1131_v22  ;;  %v1133_v24 = vunpack.c.h.bf16 %v1131_v22  ;;  %v1304_v27 = vld [vmem:[%s1430_s18] sm:$0xff]  ;;  %v1305_v29 = vld [vmem:[%s1578_s1 + $0xb0] sm:$0xff]   ;;  %v1307_v31 = vld [vmem:[%s1578_s1 + $0xa8] sm:$0xff]  }
  0x14   : > { %v1308_v30 = vld [vmem:[%s1580_s3 + $0x10] sm:$0xff]   ;;  %v1310_v32 = vld [vmem:[%s1580_s3 + $0x8] sm:$0xff]   ;;  %v1309_v33 = vld [vmem:[%s1578_s1 + $0xa0] sm:$0xff]  }
  0x15   : > { %1186 = vmatpush3.bf16.msra.mxu0 %v1291_v5  ;;  %642 = vst.msk [vmem:[#allocation3 + $0x1] sm:$0xff] %vm633_vm1, %v1132_v23  ;;  %643 = vst.msk [vmem:[#allocation3 + $0x9] sm:$0xff] %vm633_vm1, %v1133_v24  ;;  %v1312_v34 = vld [vmem:[%s1580_s3] sm:$0xff]   ;;  %v1311_v37 = vld [vmem:[%s1578_s1 + $0x98] sm:$0xff]  }
  0x16   : > { %1206 = vmatpush3.bf16.msra.mxu1 %v1292_v6  ;;  %1187 = vmatprep.subr.bf16.mxu0 %v1332_v1  ;;  %v1314_v39 = vld [vmem:[%s1580_s3 + $0x38] sm:$0xff]   ;;  %v1313_v40 = vld [vmem:[%s1578_s1 + $0x90] sm:$0xff]   ;;  %v1315_v42 = vld [vmem:[%s1578_s1 + $0x88] sm:$0xff]  }
  0x17   : > { %1207 = vmatprep.subr.bf16.mxu1 %v1332_v1  ;;  %v1316_v41 = vld [vmem:[%s1580_s3 + $0x30] sm:$0xff]   ;;  %v1318_v43 = vld [vmem:[%s1580_s3 + $0x28] sm:$0xff]   ;;  %v1317_v44 = vld [vmem:[%s1578_s1 + $0x80] sm:$0xff]  }
  0x18   : > { %v1319_v47 = vld [vmem:[%s1580_s3 + $0x20] sm:$0xff]   ;;  %v1320_v51 = vld [vmem:[%s1580_s3 + $0x58] sm:$0xff]   ;;  %v1321_v53 = vld [vmem:[%s1580_s3 + $0x50] sm:$0xff]  }
  0x19   : > { %1188 = vmatpush3.bf16.msra.mxu0 %v1293_v7  ;;  %v301_v19 = vld [vmem:[#allocation2] sm:$0xff]  ;;  %v302_v20 = vld [vmem:[#allocation2 + $0x8] sm:$0xff] }
  0x1a   : > { %1208 = vmatpush3.bf16.msra.mxu1 %v1294_v8  ;;  %1189 = vmatprep.subr.bf16.mxu0 %v1332_v1  ;;  %v303_v25 = vpack.c.bf16 %v302_v20, %v301_v19  ;;  %v522_v45 = vld [vmem:[#allocation2 + $0x2] sm:$0xff]  ;;  %v523_v46 = vld [vmem:[#allocation2 + $0xa] sm:$0xff] }
  0x1b   : > { %1209 = vmatprep.subr.bf16.mxu1 %v1332_v1  ;;  %v524_v50 = vpack.c.bf16 %v523_v46, %v522_v45  ;;  %v1322_v54 = vld [vmem:[%s1580_s3 + $0x48] sm:$0xff]   ;;  %v1323_v55 = vld [vmem:[%s1580_s3 + $0x40] sm:$0xff]  }
  0x1c   : > { %v644_v35 = vld [vmem:[#allocation3] sm:$0xff]  ;;  %v645_v36 = vld [vmem:[#allocation3 + $0x8] sm:$0xff] }
  0x1d   : > { %1190 = vmatpush3.bf16.msra.mxu0 %v1295_v9  ;;  %v646_v38 = vpack.c.bf16 %v645_v36, %v644_v35  ;;  %v725_v48 = vld [vmem:[#allocation3 + $0x1] sm:$0xff]  ;;  %v726_v49 = vld [vmem:[#allocation3 + $0x9] sm:$0xff] }
  0x1e   : > { %1210 = vmatpush3.bf16.msra.mxu1 %v1296_v10  ;;  %1191 = vmatprep.subr.bf16.mxu0 %v1332_v1  ;;  %v727_v52 = vpack.c.bf16 %v726_v49, %v725_v48  ;;  %v807_v56 = vld [vmem:[#allocation3 + $0x2] sm:$0xff]  ;;  %v808_v57 = vld [vmem:[#allocation3 + $0xa] sm:$0xff] }
  0x1f   : > { %1211 = vmatprep.subr.bf16.mxu1 %v1332_v1  ;;  %v809_v58 = vpack.c.bf16 %v808_v57, %v807_v56 }
  0x21   : > { %1192 = vmatpush3.bf16.msra.mxu0 %v1297_v14 }
  0x22   : > { %1212 = vmatpush3.bf16.msra.mxu1 %v1298_v15  ;;  %1193 = vmatprep.subr.bf16.mxu0 %v1332_v1 }
  0x23   : > { %1213 = vmatprep.subr.bf16.mxu1 %v1332_v1 }
  0x25   : > { %1194 = vmatpush3.bf16.msra.mxu0 %v1299_v16 }
  0x26   : > { %1214 = vmatpush3.bf16.msra.mxu1 %v1300_v17  ;;  %1195 = vmatprep.subr.bf16.mxu0 %v1332_v1 }
  0x27   : > { %1215 = vmatprep.subr.bf16.mxu1 %v1332_v1 }
  0x29   : > { %1196 = vmatpush3.bf16.msra.mxu0 %v1301_v18 }
  0x2a   : > { %1216 = vmatpush3.bf16.msra.mxu1 %v1302_v21  ;;  %1221 = vmatprep.subr.bf16.mxu0 %v1332_v1 }
  0x2b   : > { %1241 = vmatprep.subr.bf16.mxu1 %v1332_v1 }
  0x2c   : > { %1198 = vmatmul.mubr.bf16.vlgmr.msra.gmra.mxu0 %v303_v25 }
  0x2d   : > { %1222 = vmatpush3.bf16.msra.mxu0 %v1303_v26  ;;  %1218 = vmatmul.mubr.bf16.vlgmr.msra.gmra.mxu1 %v1304_v27 }
  0x2e   : > { %1223 = vmatprep.subr.bf16.mxu0 %v1332_v1  ;;  %1242 = vmatpush3.bf16.msra.mxu1 %v1306_v28 }
  0x2f   : > { %1243 = vmatprep.subr.bf16.mxu1 %v1332_v1  ;;  %1249 = vmatprep.mubr.msk.bf16.mxu1 %vm1333_vm0, %v1332_v1 }
  0x30   : > { %1237 = vmatprep.mubr.msk.bf16.mxu0 %vm1333_vm0, %v1332_v1 }
  0x31   : > { %1224 = vmatpush3.bf16.msra.mxu0 %v1305_v29 }
  0x32   : > { %1225 = vmatprep.subr.bf16.mxu0 %v1332_v1  ;;  %1244 = vmatpush3.bf16.msra.mxu1 %v1308_v30 }
  0x33   : > { %1245 = vmatprep.subr.bf16.mxu1 %v1332_v1 }
  0x35   : > { %1226 = vmatpush3.bf16.msra.mxu0 %v1307_v31 }
  0x36   : > { %1227 = vmatprep.subr.bf16.mxu0 %v1332_v1  ;;  %1246 = vmatpush3.bf16.msra.mxu1 %v1310_v32 }
  0x37   : > { %1247 = vmatprep.subr.bf16.mxu1 %v1332_v1 }
  0x39   : > { %1228 = vmatpush3.bf16.msra.mxu0 %v1309_v33 }
  0x3a   : > { %1229 = vmatprep.subr.bf16.mxu0 %v1332_v1  ;;  %1248 = vmatpush3.bf16.msra.mxu1 %v1312_v34 }
  0x3b   : > { %1253 = vmatprep.subr.bf16.mxu1 %v1332_v1 }
  0x3d   : > { %1230 = vmatpush3.bf16.msra.mxu0 %v1311_v37  ;;  %1250 = vmatmul.mubr.msk.bf16.vlgmr.msra.gmra.mxu1 %vm633_vm1, %v646_v38 }
  0x3e   : > { %1231 = vmatprep.subr.bf16.mxu0 %v1332_v1  ;;  %1254 = vmatpush3.bf16.msra.mxu1 %v1314_v39 }
  0x3f   : > { %1255 = vmatprep.subr.bf16.mxu1 %v1332_v1  ;;  %1261 = vmatprep.mubr.msk.bf16.mxu1 %vm1333_vm0, %v1332_v1 }
  0x41   : > { %1232 = vmatpush3.bf16.msra.mxu0 %v1313_v40 }
  0x42   : > { %1233 = vmatprep.subr.bf16.mxu0 %v1332_v1  ;;  %1256 = vmatpush3.bf16.msra.mxu1 %v1316_v41 }
  0x43   : > { %1257 = vmatprep.subr.bf16.mxu1 %v1332_v1 }
  0x45   : > { %1234 = vmatpush3.bf16.msra.mxu0 %v1315_v42 }
  0x46   : > { %1235 = vmatprep.subr.bf16.mxu0 %v1332_v1  ;;  %1258 = vmatpush3.bf16.msra.mxu1 %v1318_v43 }
  0x47   : > { %1259 = vmatprep.subr.bf16.mxu1 %v1332_v1 }
  0x49   : > { %1236 = vmatpush3.bf16.msra.mxu0 %v1317_v44 }
  0x4a   : > { %1265 = vmatprep.subr.bf16.mxu0 %v1332_v1  ;;  %1260 = vmatpush3.bf16.msra.mxu1 %v1319_v47 }
  0x4c   : > { %1238 = vmatmul.mubr.bf16.vlgmr.msra.gmra.mxu0 %v524_v50 }
  0x4d   : > { %1266 = vmatpush3.bf16.msra.mxu0 %v1320_v51  ;;  %1262 = vmatmul.mubr.msk.bf16.vlgmr.msra.gmra.mxu1 %vm633_vm1, %v727_v52 }
  0x4e   : > { %1267 = vmatprep.subr.bf16.mxu0 %v1332_v1  ;;  %1273 = vmatprep.mubr.msk.bf16.mxu0 %vm1333_vm0, %v1332_v1 }
  0x51   : > { %1268 = vmatpush3.bf16.msra.mxu0 %v1321_v53 }
  0x52   : > { %1269 = vmatprep.subr.bf16.mxu0 %v1332_v1 }
  0x55   : > { %1270 = vmatpush3.bf16.msra.mxu0 %v1322_v54 }
  0x56   : > { %1271 = vmatprep.subr.bf16.mxu0 %v1332_v1  ;;  %v1029_v1 = vld [vmem:[%s1581_s4] ss:$0 sm:$0xff] }
  0x59   : > { %1272 = vmatpush3.bf16.msra.mxu0 %v1323_v55 }
  0x5c   : > { %1274 = vmatmul.mubr.msk.bf16.vlgmr.msra.gmra.mxu0 %vm633_vm1, %v809_v58 }
  0xec   : > { %v402_v59 = vpop.f32.mrf.mxu0 }
  0xed   : > { %v513_v60 = vpop.f32.mrf.mxu1  ;;  %v409_v9 = vadd.f32 %v1029_v1, %v402_v59 }
  0xee   : > { %v1199_v61 = vpop.f32.mrf.mxu0 }
  0xef   : > { %v1219_v62 = vpop.f32.mrf.mxu1  ;;  %v520_v14 = vadd.f32 %v513_v60, %v409_v9 }
  0xf0   : > { %v405_v63 = vpop.f32.mrf.mxu0 }
  0xf1   : > { %v516_v0 = vpop.f32.mrf.mxu1  ;;  %v410_v15 = vadd.f32 %v1029_v1, %v405_v63 }
  0xf2   : > { %v1200_v2 = vpop.f32.mrf.mxu0 }
  0xf3   : > { %v1220_v3 = vpop.f32.mrf.mxu1  ;;  %v521_v20 = vadd.f32 %v516_v0, %v410_v15 }
  0xfd   : > { %v716_v4 = vpop.f32.mrf.mxu1 }
  0xff   : > { %v1251_v5 = vpop.f32.mrf.mxu1 }
 0x101   : > { %v719_v6 = vpop.f32.mrf.mxu1 }
 0x103   : > { %v1252_v7 = vpop.f32.mrf.mxu1 }
 0x10c   : > { %v624_v8 = vpop.f32.mrf.mxu0 }
 0x10d   : > { %v798_v10 = vpop.f32.mrf.mxu1  ;;  %v631_v18 = vadd.f32 %v624_v8, %v520_v14 }
 0x10e   : > { %v1239_v11 = vpop.f32.mrf.mxu0 }
 0x10f   : > { %v1263_v12 = vpop.f32.mrf.mxu1  ;;  %v723_v22 = vadd.f32 %v716_v4, %v631_v18 }
 0x110   : > { %v627_v13 = vpop.f32.mrf.mxu0 }
 0x111   : > { %v801_v16 = vpop.f32.mrf.mxu1  ;;  %v632_v21 = vadd.f32 %v627_v13, %v521_v20  ;;  %v805_v23 = vadd.f32 %v798_v10, %v723_v22 }
 0x112   : > { %v1240_v17 = vpop.f32.mrf.mxu0 }
 0x113   : > { %v1264_v19 = vpop.f32.mrf.mxu1  ;;  %v724_v24 = vadd.f32 %v719_v6, %v632_v21 }
 0x115   : > { %v806_v28 = vadd.f32 %v801_v16, %v724_v24 }
 0x11c   : > { %v880_v25 = vpop.f32.mrf.mxu0 }
 0x11d   : > { %v887_v26 = vadd.f32 %v880_v25, %v805_v23 }
 0x11e   : > { %v1275_v27 = vpop.f32.mrf.mxu0 }
 0x11f   : > { %v889_v30 = vmax.f32 %v887_v26, 0.0 }
 0x120   : > { %v883_v29 = vpop.f32.mrf.mxu0 }
 0x121   : > { %v888_v31 = vadd.f32 %v883_v29, %v806_v28  ;;  %v909_v34 = vmul.f32 %v889_v30, %v889_v30 }
 0x122   : > { %v1276_v32 = vpop.f32.mrf.mxu0 }
 0x123   : > { %v890_v33 = vmax.f32 %v888_v31, 0.0 }
 0x125   : > { %v1137_v35 = vpack.c.bf16 %v890_v33, %v889_v30  ;;  %v901_v36 = vadd.f32 %v890_v33, %v889_v30  ;;  %v910_v37 = vmul.f32 %v890_v33, %v890_v33 }
 0x127   : > { %1138 = vst [vmem:[%s278_s20] sm:$0xff] %v1137_v35   ;;  %v902_v38 = vrot.slane %v901_v36, 4  ;;  %v911_v39 = vadd.f32 %v910_v37, %v909_v34 }
 0x129   : > { %v903_v40 = vadd.f32 %v902_v38, %v901_v36  ;;  %v912_v41 = vrot.slane %v911_v39, 4 }
 0x12b   : > { %v904_v42 = vrot.slane %v903_v40, 2  ;;  %v913_v43 = vadd.f32 %v912_v41, %v911_v39 }
 0x12d   : > { %v905_v44 = vadd.f32 %v904_v42, %v903_v40  ;;  %v914_v45 = vrot.slane %v913_v43, 2 }
 0x12f   : > { %v906_v46 = vrot.slane %v905_v44, 1  ;;  %v915_v47 = vadd.f32 %v914_v45, %v913_v43 }
 0x131   : > { %v907_v48 = vadd.f32 %v906_v46, %v905_v44  ;;  %v916_v49 = vrot.slane %v915_v47, 1 }
 0x133   : > { %908 = vst [vmem:[%s282_s13] sm:$0x1] %v907_v48  ;;  %v917_v50 = vadd.f32 %v916_v49, %v915_v47 }
 0x135   : > { %918 = vst [vmem:[%s282_s13 + $0x1] sm:$0x1] %v917_v50 }
 0x136 PF: > { %s17_s21 = sadd.s32 1, %s1330_s21  }
 0x137   : > { %p14_p4 = scmp.ge.s32.totalorder %s17_s21, 4  }
 0x139   :  { %16 = sbr.rel (!%p14_p4) target bundleno = 1 (0x1), region = 89 }

// kernel: unet_block_up.5
= control target key start
LH: loop header
LB: loop body
LE: loop exit
PB: predicated region body
PF: predicated region fallthrough
CT: control target
= control target key end

     0   :  { %s916_s15 = smov 0   ;;  %s1056_s0 = inlined_call_operand.vmem [shape: bf16[2,16,128], index: 0, kind: input, shape index: {}]   ;;  %s1057_s1 = inlined_call_operand.vmem [shape: bf16[3,128,128], index: 1, kind: input, shape index: {}]   ;;  %s1058_s2 = inlined_call_operand.vmem [shape: f32[1,128], index: 2, kind: input, shape index: {}]   ;;  %s1059_s3 = inlined_call_operand.vmem [shape: bf16[2,16,128], index: 3, kind: output, shape index: {0}]   ;;  %s1060_s4 = inlined_call_operand.vmem [shape: f32[2,2,128], index: 4, kind: output, shape index: {1}]  }
   0x1 LB: > { %s675_s16 = sadd.s32 4294967295, %s887_s15   ;;  %p679_p0 = scmp.ge.s32.totalorder %s887_s15, 1  ;;  %s887_s15 = sphi %s916_s15, %s15_s15  }
   0x2   : > { %p165_p1 = scmp.lt.s32.totalorder %s887_s15, 3 }
   0x4   : > { %p166_p2 = pnand %p679_p0, %p165_p1 }
   0x5   : > { %p195_p3 = scmp.lt.s32.totalorder (!%p166_p2), %s675_s16, 1 }
   0x6   : > { %169 = sbr.rel (%p166_p2) target bundleno = 294 (0x126), region = 32 }
   0xb   : > { %v856_v0 = vld [vmem:[%s1057_s1 + $0x38] sm:$0xff]   ;;  %v889_v1 = vmov 0.0   ;;  %v858_v3 = vld [vmem:[%s1057_s1 + $0x30] sm:$0xff]   ;;  %vm890_vm0 = vmmov 0   ;;  %v860_v5 = vld [vmem:[%s1057_s1 + $0x28] sm:$0xff]   ;;  %s1062_s16 = smov (!%p195_p3, %s675_s16), 1 }
   0xc   : > { %786 = vmatprep.subr.bf16.mxu0 %v889_v1  ;;  %218 = vst [vmem:[#allocation2] sm:$0xff] %v889_v1  ;;  %219 = vst [vmem:[#allocation2 + $0x8] sm:$0xff] %v889_v1  ;;  %806 = vmatprep.subr.bf16.mxu1 %v889_v1  ;;  %v857_v2 = vld [vmem:[%s1057_s1 + $0x78] sm:$0xff]   ;;  %v859_v4 = vld [vmem:[%s1057_s1 + $0x70] sm:$0xff]   ;;  %s746_s5 = sshll.u32 %s1062_s16, 3  ;;  %s684_s27 = sshll.u32 %s1062_s16, 1 }
   0xd   : > { %220 = vst [vmem:[#allocation2 + $0x10] sm:$0x3] %v889_v1  ;;  %787 = vmatpush3.bf16.msra.mxu0 %v856_v0  ;;  %802 = vmatprep.mubr.msk.bf16.mxu0 %vm890_vm0, %v889_v1  ;;  %v861_v6 = vld [vmem:[%s1057_s1 + $0x68] sm:$0xff]   ;;  %v862_v7 = vld [vmem:[%s1057_s1 + $0x20] sm:$0xff]   ;;  %s971_s10 = scalar_lea.vmem %s1056_s0, %s746_s5  ;;  %v864_v9 = vld [vmem:[%s1057_s1 + $0x18] sm:$0xff]   ;;  %s204_s26 = scalar_lea.vmem %s1059_s3, %s746_s5 }
   0xe   : > { %807 = vmatpush3.bf16.msra.mxu1 %v857_v2  ;;  %788 = vmatprep.subr.bf16.mxu0 %v889_v1  ;;  %v863_v8 = vld [vmem:[%s1057_s1 + $0x60] sm:$0xff]   ;;  %v865_v10 = vld [vmem:[%s1057_s1 + $0x58] sm:$0xff]   ;;  %v866_v14 = vld [vmem:[%s1057_s1 + $0x10] sm:$0xff]   ;;  %s208_s5 = scalar_lea.vmem %s1060_s4, %s684_s27 }
   0xf   : > { %808 = vmatprep.subr.bf16.mxu1 %v889_v1  ;;  %822 = vmatprep.mubr.msk.bf16.mxu1 %vm890_vm0, %v889_v1  ;;  %v751_v11 = vld [vmem:[%s971_s10] sm:$0xff]   ;;  %v867_v15 = vld [vmem:[%s1057_s1 + $0x50] sm:$0xff]   ;;  %v868_v16 = vld [vmem:[%s1057_s1 + $0x8] sm:$0xff]  }
  0x10   : > { %v752_v12 = vunpack.c.l.bf16 %v751_v11  ;;  %v753_v13 = vunpack.c.h.bf16 %v751_v11  ;;  %v869_v17 = vld [vmem:[%s1057_s1 + $0x48] sm:$0xff]   ;;  %v870_v18 = vld [vmem:[%s1057_s1] sm:$0xff]   ;;  %v872_v23 = vld [vmem:[%s1057_s1 + $0xb8] sm:$0xff]  }
  0x11   : > { %789 = vmatpush3.bf16.msra.mxu0 %v858_v3  ;;  %v871_v21 = vld [vmem:[%s1057_s1 + $0x40] sm:$0xff]   ;;  %v874_v25 = vld [vmem:[%s1057_s1 + $0xb0] sm:$0xff]   ;;  %v875_v26 = vld [vmem:[%s1057_s1 + $0xa8] sm:$0xff]  }
  0x12   : > { %809 = vmatpush3.bf16.msra.mxu1 %v859_v4  ;;  %790 = vmatprep.subr.bf16.mxu0 %v889_v1  ;;  %225 = vst [vmem:[#allocation2 + $0x1] sm:$0xff] %v752_v12  ;;  %226 = vst [vmem:[#allocation2 + $0x9] sm:$0xff] %v753_v13  ;;  %v873_v24 = vld [vmem:[%s971_s10] sm:$0xff]  ;;  %v877_v28 = vld [vmem:[%s1057_s1 + $0x98] sm:$0xff]  }
  0x13   : > { %810 = vmatprep.subr.bf16.mxu1 %v889_v1  ;;  %v876_v27 = vld [vmem:[%s1057_s1 + $0xa0] sm:$0xff]   ;;  %v878_v29 = vld [vmem:[%s1057_s1 + $0x90] sm:$0xff]   ;;  %v879_v30 = vld [vmem:[%s1057_s1 + $0x88] sm:$0xff]  }
  0x14   : > { %v880_v31 = vld [vmem:[%s1057_s1 + $0x80] sm:$0xff]  }
  0x15   : > { %791 = vmatpush3.bf16.msra.mxu0 %v860_v5  ;;  %v685_v43 = vld [vmem:[%s1058_s2] ss:$0 sm:$0xff] }
  0x16   : > { %811 = vmatpush3.bf16.msra.mxu1 %v861_v6  ;;  %792 = vmatprep.subr.bf16.mxu0 %v889_v1 }
  0x17   : > { %812 = vmatprep.subr.bf16.mxu1 %v889_v1 }
  0x19   : > { %793 = vmatpush3.bf16.msra.mxu0 %v862_v7  ;;  %v227_v19 = vld [vmem:[#allocation2] sm:$0xff]  ;;  %v228_v20 = vld [vmem:[#allocation2 + $0x8] sm:$0xff] }
  0x1a   : > { %813 = vmatpush3.bf16.msra.mxu1 %v863_v8  ;;  %794 = vmatprep.subr.bf16.mxu0 %v889_v1  ;;  %v229_v22 = vpack.c.bf16 %v228_v20, %v227_v19  ;;  %v448_v32 = vld [vmem:[#allocation2 + $0x2] sm:$0xff]  ;;  %v449_v33 = vld [vmem:[#allocation2 + $0xa] sm:$0xff] }
  0x1b   : > { %814 = vmatprep.subr.bf16.mxu1 %v889_v1  ;;  %v450_v34 = vpack.c.bf16 %v449_v33, %v448_v32 }
  0x1d   : > { %795 = vmatpush3.bf16.msra.mxu0 %v864_v9 }
  0x1e   : > { %815 = vmatpush3.bf16.msra.mxu1 %v865_v10  ;;  %796 = vmatprep.subr.bf16.mxu0 %v889_v1 }
  0x1f   : > { %816 = vmatprep.subr.bf16.mxu1 %v889_v1 }
  0x21   : > { %797 = vmatpush3.bf16.msra.mxu0 %v866_v14 }
  0x22   : > { %817 = vmatpush3.bf16.msra.mxu1 %v867_v15  ;;  %798 = vmatprep.subr.bf16.mxu0 %v889_v1 }
  0x23   : > { %818 = vmatprep.subr.bf16.mxu1 %v889_v1 }
  0x25   : > { %799 = vmatpush3.bf16.msra.mxu0 %v868_v16 }
  0x26   : > { %819 = vmatpush3.bf16.msra.mxu1 %v869_v17  ;;  %800 = vmatprep.subr.bf16.mxu0 %v889_v1 }
  0x27   : > { %820 = vmatprep.subr.bf16.mxu1 %v889_v1 }
  0x29   : > { %801 = vmatpush3.bf16.msra.mxu0 %v870_v18 }
  0x2a   : > { %821 = vmatpush3.bf16.msra.mxu1 %v871_v21  ;;  %826 = vmatprep.subr.bf16.mxu0 %v889_v1 }
  0x2c   : > { %803 = vmatmul.mubr.bf16.vlgmr.msra.gmra.mxu0 %v229_v22 }
  0x2d   : > { %827 = vmatpush3.bf16.msra.mxu0 %v872_v23  ;;  %823 = vmatmul.mubr.bf16.vlgmr.msra.gmra.mxu1 %v873_v24 }
  0x2e   : > { %828 = vmatprep.subr.bf16.mxu0 %v889_v1  ;;  %842 = vmatprep.mubr.msk.bf16.mxu0 %vm890_vm0, %v889_v1 }
  0x31   : > { %829 = vmatpush3.bf16.msra.mxu0 %v874_v25 }
  0x32   : > { %830 = vmatprep.subr.bf16.mxu0 %v889_v1 }
  0x35   : > { %831 = vmatpush3.bf16.msra.mxu0 %v875_v26 }
  0x36   : > { %832 = vmatprep.subr.bf16.mxu0 %v889_v1 }
  0x39   : > { %833 = vmatpush3.bf16.msra.mxu0 %v876_v27 }
  0x3a   : > { %834 = vmatprep.subr.bf16.mxu0 %v889_v1 }
  0x3d   : > { %835 = vmatpush3.bf16.msra.mxu0 %v877_v28 }
  0x3e   : > { %836 = vmatprep.subr.bf16.mxu0 %v889_v1 }
  0x41   : > { %837 = vmatpush3.bf16.msra.mxu0 %v878_v29 }
  0x42   : > { %838 = vmatprep.subr.bf16.mxu0 %v889_v1 }
  0x45   : > { %839 = vmatpush3.bf16.msra.mxu0 %v879_v30 }
  0x46   : > { %840 = vmatprep.subr.bf16.mxu0 %v889_v1 }
  0x49   : > { %841 = vmatpush3.bf16.msra.mxu0 %v880_v31 }
  0x4c   : > { %843 = vmatmul.mubr.bf16.vlgmr.msra.gmra.mxu0 %v450_v34 }
  0xec   : > { %v328_v35 = vpop.f32.mrf.mxu0 }
  0xed   : > { %v439_v36 = vpop.f32.mrf.mxu1  ;;  %v335_v44 = vadd.f32 %v685_v43, %v328_v35 }
  0xee   : > { %v804_v37 = vpop.f32.mrf.mxu0 }
  0xef   : > { %v824_v38 = vpop.f32.mrf.mxu1  ;;  %v446_v45 = vadd.f32 %v439_v36, %v335_v44 }
  0xf0   : > { %v331_v39 = vpop.f32.mrf.mxu0 }
  0xf1   : > { %v442_v40 = vpop.f32.mrf.mxu1  ;;  %v336_v46 = vadd.f32 %v685_v43, %v331_v39 }
  0xf2   : > { %v805_v41 = vpop.f32.mrf.mxu0 }
  0xf3   : > { %v825_v42 = vpop.f32.mrf.mxu1  ;;  %v447_v50 = vadd.f32 %v442_v40, %v336_v46 }
 0x10c   : > { %v550_v47 = vpop.f32.mrf.mxu0 }
 0x10d   : > { %v557_v48 = vadd.f32 %v550_v47, %v446_v45 }
 0x10e   : > { %v844_v49 = vpop.f32.mrf.mxu0 }
 0x10f   : > { %v559_v52 = vmax.f32 %v557_v48, 0.0 }
 0x110   : > { %v553_v51 = vpop.f32.mrf.mxu0 }
 0x111   : > { %v558_v53 = vadd.f32 %v553_v51, %v447_v50  ;;  %v579_v56 = vmul.f32 %v559_v52, %v559_v52 }
 0x112   : > { %v845_v54 = vpop.f32.mrf.mxu0 }
 0x113   : > { %v560_v55 = vmax.f32 %v558_v53, 0.0 }
 0x115   : > { %v757_v57 = vpack.c.bf16 %v560_v55, %v559_v52  ;;  %v571_v58 = vadd.f32 %v560_v55, %v559_v52  ;;  %v580_v59 = vmul.f32 %v560_v55, %v560_v55 }
 0x117   : > { %758 = vst [vmem:[%s204_s26] sm:$0xff] %v757_v57   ;;  %v572_v60 = vrot.slane %v571_v58, 4  ;;  %v581_v61 = vadd.f32 %v580_v59, %v579_v56 }
 0x119   : > { %v573_v62 = vadd.f32 %v572_v60, %v571_v58  ;;  %v582_v63 = vrot.slane %v581_v61, 4 }
 0x11b   : > { %v574_v0 = vrot.slane %v573_v62, 2  ;;  %v583_v1 = vadd.f32 %v582_v63, %v581_v61 }
 0x11d   : > { %v575_v2 = vadd.f32 %v574_v0, %v573_v62  ;;  %v584_v3 = vrot.slane %v583_v1, 2 }
 0x11f   : > { %v576_v4 = vrot.slane %v575_v2, 1  ;;  %v585_v5 = vadd.f32 %v584_v3, %v583_v1 }
 0x121   : > { %v577_v6 = vadd.f32 %v576_v4, %v575_v2  ;;  %v586_v7 = vrot.slane %v585_v5, 1 }
 0x123   : > { %578 = vst [vmem:[%s208_s5] sm:$0x1] %v577_v6  ;;  %v587_v8 = vadd.f32 %v586_v7, %v585_v5 }
 0x125   : > { %588 = vst [vmem:[%s208_s5 + $0x1] sm:$0x1] %v587_v8 }
 0x126 PF: > { %s15_s15 = sadd.s32 1, %s887_s15  }
 0x127   : > { %p12_p4 = scmp.ge.s32.totalorder %s15_s15, 4  }
 0x129   :  { %14 = sbr.rel (!%p12_p4) target bundleno = 1 (0x1), region = 76 }

</bundles_post_ra>
